<compile_context>
chip_gen: v6e
topology: v6e:2x2x1
jax: 0.10.0
libtpu: 0.0.40
codegen_flags: <defaults>
</compile_context>

<pallas_src>
import jax
import jax.numpy as jnp
from jax import lax
from jax.experimental import pallas as pl
from jax.experimental.pallas import tpu as pltpu


def _round_up(x, m):
    return ((x + m - 1) // m) * m


# --------------------------------------------------------------------------
# Fused Pallas kernel (all LSTM layers, wavefront-scheduled, + final Linear)
# --------------------------------------------------------------------------
def make_lstm_kernel(num_layers, T, B, H):
    """Builds a kernel closed over static sizes.

    Gate order inside each 4H block is [i, f, o, g] (pre-permuted in prep).
    Ref order: xin, w_in, bias, w_rec, lin_w, lin_b, out, xproj_scratch.
    """
    L = num_layers
    H4 = 4 * H
    G = L * H4                 # fused gate width
    n_stages = T + L - 1       # wavefront stages

    def kernel(xin_ref, w_in_ref, bias_ref, w_rec_ref, lin_w_ref, lin_b_ref,
               out_ref, xproj_ref):
        # ---- hoisted layer-0 input projection (off the serial path) --------
        # (T*B, D) @ (D, L*4H): column block 0 = x @ W_ih0^T, other blocks 0;
        # every layer's bias added here so the per-stage addend is one
        # full-vreg add.  Parked in VMEM scratch to bound vreg live ranges.
        xproj_ref[...] = (
            jnp.dot(xin_ref[...], w_in_ref[...],
                    preferred_element_type=jnp.float32) + bias_ref[...])

        w_rec = w_rec_ref[...]                      # (L*H, L*4H) bf16
        bias_row = bias_ref[...]                    # (1, L*4H)   f32

        # Lane mask: within each 4H gate block, last H lanes (the g gate) use
        # tanh, the first 3H (i, f, o) use sigmoid.  Full-vreg EUP + select.
        lane = lax.broadcasted_iota(jnp.int32, (B, G), 1)
        tanh_mask = (lane % H4) >= 3 * H

        h = [jnp.zeros((B, H), jnp.float32) for _ in range(L)]
        c = [jnp.zeros((B, H), jnp.float32) for _ in range(L)]

        # Fully unrolled wavefront: stage s runs layer l at time t = s - l.
        for s in range(n_stages):
            lhs = jnp.concatenate(h, axis=1) if L > 1 else h[0]   # (B, L*H)
            rec = jnp.dot(lhs.astype(jnp.bfloat16), w_rec,
                          preferred_element_type=jnp.float32)     # (B, L*4H)
            if s < T:
                addend = xproj_ref[s * B:(s + 1) * B, :]          # static slice
            else:
                addend = bias_row                                 # tail stages
            gates = rec + addend
            act = jnp.where(tanh_mask, jnp.tanh(gates), jax.nn.sigmoid(gates))

            for l in range(L):
                t = s - l
                if 0 <= t < T:                     # static: active layers only
                    b0 = l * H4
                    i_g = act[:, b0 + 0 * H: b0 + 1 * H]
                    f_g = act[:, b0 + 1 * H: b0 + 2 * H]
                    o_g = act[:, b0 + 2 * H: b0 + 3 * H]
                    g_g = act[:, b0 + 3 * H: b0 + 4 * H]
                    c[l] = f_g * c[l] + i_g * g_g
                    h[l] = o_g * jnp.tanh(c[l])

        # ---- final Linear on the last layer's last-timestep hidden state ---
        out = jnp.dot(h[L - 1].astype(jnp.bfloat16), lin_w_ref[...],
                      preferred_element_type=jnp.float32) + lin_b_ref[...]
        out_ref[...] = out.astype(out_ref.dtype)

    return kernel


# --------------------------------------------------------------------------
# One-time weight preparation (NOT on the per-call path)
# --------------------------------------------------------------------------
def _perm_gate_rows(w):
    """Permute PyTorch gate blocks [i, f, g, o] -> [i, f, o, g] along rows."""
    i, f, g, o = jnp.split(w, 4, axis=0)
    return jnp.concatenate([i, f, o, g], axis=0)


def prepare_params(lstm_params, lin_w, lin_b):
    """Transpose/permute/fuse/pad all weights once; reuse across forward calls."""
    L = len(lstm_params)
    H = lstm_params[0][1].shape[1]       # w_hh: (4H, H)
    D = lstm_params[0][0].shape[1]       # w_ih (layer 0): (4H, D)
    C = lin_w.shape[0]
    H4 = 4 * H
    G = L * H4
    # Lane-aligned gate slices require 4H to be a multiple of the 128-lane vreg.
    assert H4 % 128 == 0, "num_hidden must be a multiple of 32 for this kernel"

    # Layer-0 input projection, zero-padded to the fused gate width.
    w_in = jnp.zeros((D, G), jnp.float32)
    w_in = w_in.at[:, :H4].set(
        jnp.transpose(_perm_gate_rows(lstm_params[0][0].astype(jnp.float32))))

    # Fused block-bidiagonal recurrence matrix:
    #   rows l*H:(l+1)*H, cols  l   *4H:(l+1)*4H = W_hh_l^T
    #   rows l*H:(l+1)*H, cols (l+1)*4H:(l+2)*4H = W_ih_{l+1}^T
    w_rec = jnp.zeros((L * H, G), jnp.float32)
    bias_all = jnp.zeros((1, G), jnp.float32)
    for l, (w_ih, w_hh, b_ih, b_hh) in enumerate(lstm_params):
        whh_t = jnp.transpose(_perm_gate_rows(w_hh.astype(jnp.float32)))
        w_rec = w_rec.at[l * H:(l + 1) * H, l * H4:(l + 1) * H4].set(whh_t)
        if l + 1 < L:
            wih_next_t = jnp.transpose(
                _perm_gate_rows(lstm_params[l + 1][0].astype(jnp.float32)))
            w_rec = w_rec.at[l * H:(l + 1) * H,
                             (l + 1) * H4:(l + 2) * H4].set(wih_next_t)
        b = (b_ih + b_hh).astype(jnp.float32)
        bi, bf, bg, bo = jnp.split(b, 4)
        bias_all = bias_all.at[0, l * H4:(l + 1) * H4].set(
            jnp.concatenate([bi, bf, bo, bg]))

    C_pad = _round_up(C, 128)            # lane-dense output store
    lin_w_t = jnp.pad(jnp.transpose(lin_w.astype(jnp.float32)),
                      ((0, 0), (0, C_pad - C)))                  # (H, C_pad)
    lin_b_p = jnp.pad(lin_b.astype(jnp.float32),
                      (0, C_pad - C)).reshape(1, C_pad)          # (1, C_pad)

    return dict(
        w_in=w_in.astype(jnp.bfloat16),      # bf16 MXU operands
        bias=bias_all,                       # f32
        w_rec=w_rec.astype(jnp.bfloat16),
        lin_w=lin_w_t.astype(jnp.bfloat16),
        lin_b=lin_b_p,                       # f32
        H=H, L=L, C=C,
    )


# --------------------------------------------------------------------------
# Forward wrapper: one fused pallas_call; only x pad/reshape per call
# --------------------------------------------------------------------------
def make_lstm_forward(prepped):
    w_in, bias = prepped["w_in"], prepped["bias"]
    w_rec, lin_w, lin_b = prepped["w_rec"], prepped["lin_w"], prepped["lin_b"]
    H, L, C = prepped["H"], prepped["L"], prepped["C"]
    G = L * 4 * H
    C_pad = lin_w.shape[1]

    @jax.jit
    def forward(x):
        T, B, D = x.shape
        B_pad = _round_up(B, 8)                       # sublane width
        xin = jnp.pad(x.astype(jnp.float32), ((0, 0), (0, B_pad - B), (0, 0)))
        xin = xin.reshape(T * B_pad, D).astype(jnp.bfloat16)   # (T*B, D)

        kernel = make_lstm_kernel(L, T, B_pad, H)
        n_stages = T + L - 1
        cost = pl.CostEstimate(
            flops=2 * (T * B_pad * D * G
                       + n_stages * B_pad * (L * H) * G
                       + B_pad * H * C_pad),
            transcendentals=3 * n_stages * B_pad * G,
            bytes_accessed=(xin.size * 2 + w_in.size * 2 + w_rec.size * 2
                            + bias.size * 4 + lin_w.size * 2 + lin_b.size * 4
                            + B_pad * C_pad * 4),
        )

        out = pl.pallas_call(
            kernel,
            out_shape=jax.ShapeDtypeStruct((B_pad, C_pad), jnp.float32),
            in_specs=[pl.BlockSpec(memory_space=pltpu.MemorySpace.VMEM)] * 6,
            out_specs=pl.BlockSpec(memory_space=pltpu.MemorySpace.VMEM),
            scratch_shapes=[pltpu.VMEM((T * B_pad, G), jnp.float32)],
            cost_estimate=cost,
        )(xin, w_in, bias, w_rec, lin_w, lin_b)

        return out[:B, :C]

    return forward


# --------------------------------------------------------------------------
# Pure-JAX f32 reference (for correctness check)
# --------------------------------------------------------------------------
def lstm_model_ref(x, lstm_params, lin_w, lin_b):
    h_seq = x
    for (w_ih, w_hh, b_ih, b_hh) in lstm_params:
        B = x.shape[1]
        H = w_hh.shape[1]

        def step(carry, xt):
            h, c = carry
            gates = xt @ w_ih.T + b_ih + h @ w_hh.T + b_hh
            i_g, f_g, g_g, o_g = jnp.split(gates, 4, axis=-1)
            i_g = jax.nn.sigmoid(i_g)
            f_g = jax.nn.sigmoid(f_g)
            g_g = jnp.tanh(g_g)
            o_g = jax.nn.sigmoid(o_g)
            c = f_g * c + i_g * g_g
            h = o_g * jnp.tanh(c)
            return (h, c), h

        init = (jnp.zeros((B, H), jnp.float32), jnp.zeros((B, H), jnp.float32))
        _, h_seq = lax.scan(step, init, h_seq)
    return h_seq[-1] @ lin_w.T + lin_b


# --------------------------------------------------------------------------
# Main
# --------------------------------------------------------------------------
if __name__ == "__main__":
    # Module hyperparameters
    input_dim = 16
    num_hidden = 32
    hidden_layers = 2
    num_classes = 10
    batch_size = 4
    seq_len = 8

    key = jax.random.PRNGKey(0)
    bound = 1.0 / jnp.sqrt(num_hidden)  # PyTorch default init scale

    lstm_params = []
    for layer in range(hidden_layers):
        d_in = input_dim if layer == 0 else num_hidden
        key, k1, k2, k3, k4 = jax.random.split(key, 5)
        w_ih = jax.random.uniform(k1, (4 * num_hidden, d_in),
                                  minval=-bound, maxval=bound, dtype=jnp.float32)
        w_hh = jax.random.uniform(k2, (4 * num_hidden, num_hidden),
                                  minval=-bound, maxval=bound, dtype=jnp.float32)
        b_ih = jax.random.uniform(k3, (4 * num_hidden,),
                                  minval=-bound, maxval=bound, dtype=jnp.float32)
        b_hh = jax.random.uniform(k4, (4 * num_hidden,),
                                  minval=-bound, maxval=bound, dtype=jnp.float32)
        lstm_params.append((w_ih, w_hh, b_ih, b_hh))

    key, k5, k6, kx = jax.random.split(key, 4)
    lin_w = jax.random.uniform(k5, (num_classes, num_hidden),
                               minval=-bound, maxval=bound, dtype=jnp.float32)
    lin_b = jax.random.uniform(k6, (num_classes,),
                               minval=-bound, maxval=bound, dtype=jnp.float32)

    # Input: (seq_len, batch, input_dim), PyTorch nn.LSTM default layout
    x = jax.random.normal(kx, (seq_len, batch_size, input_dim), dtype=jnp.float32)

    # One-time weight prep (off the per-call hot path), then the jitted forward.
    prepped = jax.tree_util.tree_map(
        lambda a: jax.block_until_ready(a) if isinstance(a, jax.Array) else a,
        prepare_params(lstm_params, lin_w, lin_b))
    forward = make_lstm_forward(prepped)

    out = forward(x)
    out = jax.block_until_ready(out)

    ref = lstm_model_ref(x, lstm_params, lin_w, lin_b)
    ref = jax.block_until_ready(ref)

    assert out.shape == (batch_size, num_classes)
    # bf16 MXU operands (f32 accumulation/state) vs. pure-f32 reference.
    assert jnp.allclose(out, ref, atol=2e-2, rtol=2e-2), \
        "Pallas output mismatch vs reference"

    print("KERNEL_OK")
</pallas_src>

<mosaic_0001>
module attributes {stable_mosaic.version = 11 : i64} {
  func.func @kernel(%arg0: memref<64x16xbf16, #tpu.memory_space<vmem>>, %arg1: memref<16x256xbf16, #tpu.memory_space<vmem>>, %arg2: memref<1x256xf32, #tpu.memory_space<vmem>>, %arg3: memref<64x256xbf16, #tpu.memory_space<vmem>>, %arg4: memref<32x128xbf16, #tpu.memory_space<vmem>>, %arg5: memref<1x128xf32, #tpu.memory_space<vmem>>, %arg6: memref<8x128xf32, #tpu.memory_space<vmem>>, %arg7: memref<64x256xf32, #tpu.memory_space<vmem>>) attributes {dimension_semantics = [], scalar_prefetch = 0 : i64, scratch_operands = 1 : i64, tpu.core_type = #tpu.core_type<tc>} {
    %c0 = arith.constant 0 : index
    %c0_0 = arith.constant 0 : index
    %0 = vector.load %arg0[%c0, %c0_0] : memref<64x16xbf16, #tpu.memory_space<vmem>>, vector<64x16xbf16>
    %c0_1 = arith.constant 0 : index
    %c0_2 = arith.constant 0 : index
    %1 = vector.load %arg1[%c0_1, %c0_2] : memref<16x256xbf16, #tpu.memory_space<vmem>>, vector<16x256xbf16>
    %cst = arith.constant dense<0.000000e+00> : vector<64x256xf32>
    %2 = tpu.matmul %0, %1, %cst {dimension_numbers = #tpu.dot_dimension_numbers<[1], [0], [0], [1], [0, 0, 1, 1], [], []>} : vector<64x16xbf16>, vector<16x256xbf16>, vector<64x256xf32> -> vector<64x256xf32>
    %c0_3 = arith.constant 0 : index
    %c0_4 = arith.constant 0 : index
    %3 = vector.load %arg2[%c0_3, %c0_4] : memref<1x256xf32, #tpu.memory_space<vmem>>, vector<1x256xf32>
    %4 = vector.broadcast %3 : vector<1x256xf32> to vector<64x256xf32>
    %5 = arith.addf %2, %4 : vector<64x256xf32>
    %c0_5 = arith.constant 0 : index
    %c0_6 = arith.constant 0 : index
    %6 = vector.load %arg7[%c0_5, %c0_6] : memref<64x256xf32, #tpu.memory_space<vmem>>, vector<64x256xf32>
    tpu.vector_store %arg7[%c0_5, %c0_6], %5 {strides = array<i32>} : memref<64x256xf32, #tpu.memory_space<vmem>>, vector<64x256xf32>,
    %c0_7 = arith.constant 0 : index
    %c0_8 = arith.constant 0 : index
    %7 = vector.load %arg3[%c0_7, %c0_8] : memref<64x256xbf16, #tpu.memory_space<vmem>>, vector<64x256xbf16>
    %c0_9 = arith.constant 0 : index
    %c0_10 = arith.constant 0 : index
    %8 = vector.load %arg2[%c0_9, %c0_10] : memref<1x256xf32, #tpu.memory_space<vmem>>, vector<1x256xf32>
    %9 = tpu.iota {dimensions = array<i32: 1>} : vector<8x256xi32>
    %c128_i32 = arith.constant 128 : i32
    %c0_i32 = arith.constant 0 : i32
    %10 = arith.cmpi eq, %c128_i32, %c0_i32 : i32
    %c1_i32 = arith.constant 1 : i32
    %11 = arith.select %10, %c1_i32, %c128_i32 : i32
    %12 = vector.broadcast %11 : i32 to vector<8x256xi32>
    %13 = arith.remsi %9, %12 : vector<8x256xi32>
    %c0_i32_11 = arith.constant 0 : i32
    %14 = vector.broadcast %c0_i32_11 : i32 to vector<8x256xi32>
    %15 = arith.cmpi ne, %13, %14 : vector<8x256xi32>
    %c0_i32_12 = arith.constant 0 : i32
    %16 = vector.broadcast %c0_i32_12 : i32 to vector<8x256xi32>
    %17 = arith.cmpi slt, %13, %16 : vector<8x256xi32>
    %c0_i32_13 = arith.constant 0 : i32
    %18 = arith.cmpi slt, %11, %c0_i32_13 : i32
    %19 = vector.broadcast %18 : i1 to vector<8x256xi1>
    %20 = vector.broadcast %19 : vector<8x256xi1> to vector<8x256xi1>
    %21 = arith.xori %17, %20 : vector<8x256xi1>
    %22 = arith.andi %21, %15 : vector<8x256xi1>
    %23 = vector.broadcast %11 : i32 to vector<8x256xi32>
    %24 = arith.addi %13, %23 : vector<8x256xi32>
    %25 = arith.select %22, %24, %13 : vector<8x256xi1>, vector<8x256xi32>
    %c96_i32 = arith.constant 96 : i32
    %26 = vector.broadcast %c96_i32 : i32 to vector<8x256xi32>
    %27 = arith.cmpi sge, %25, %26 : vector<8x256xi32>
    %cst_14 = arith.constant 0.000000e+00 : f32
    %28 = vector.broadcast %cst_14 : f32 to vector<8x32xf32>
    %cst_15 = arith.constant 0.000000e+00 : f32
    %29 = vector.broadcast %cst_15 : f32 to vector<8x32xf32>
    %cst_16 = arith.constant 0.000000e+00 : f32
    %30 = vector.broadcast %cst_16 : f32 to vector<8x32xf32>
    %cst_17 = arith.constant 0.000000e+00 : f32
    %31 = vector.broadcast %cst_17 : f32 to vector<8x32xf32>
    %32 = tpu.concatenate %28, %29 in 1 : vector<8x32xf32>, vector<8x32xf32> -> vector<8x64xf32>
    %33 = arith.truncf %32 : vector<8x64xf32> to vector<8x64xbf16>
    %cst_18 = arith.constant dense<0.000000e+00> : vector<8x256xf32>
    %34 = tpu.matmul %33, %7, %cst_18 {dimension_numbers = #tpu.dot_dimension_numbers<[1], [0], [0], [1], [0, 0, 1, 1], [], []>} : vector<8x64xbf16>, vector<64x256xbf16>, vector<8x256xf32> -> vector<8x256xf32>
    %c0_19 = arith.constant 0 : index
    %c0_20 = arith.constant 0 : index
    %35 = vector.load %arg7[%c0_19, %c0_20] : memref<64x256xf32, #tpu.memory_space<vmem>>, vector<8x256xf32>
    %36 = arith.addf %34, %35 : vector<8x256xf32>
    %37 = math.tanh %36 : vector<8x256xf32>
    %38 = arith.negf %36 : vector<8x256xf32>
    %39 = math.exp %38 : vector<8x256xf32>
    %cst_21 = arith.constant 1.000000e+00 : f32
    %40 = vector.broadcast %cst_21 : f32 to vector<8x256xf32>
    %41 = arith.addf %40, %39 : vector<8x256xf32>
    %42 = arith.divf %40, %41 : vector<8x256xf32>
    %43 = arith.select %27, %37, %42 : vector<8x256xi1>, vector<8x256xf32>
    %44 = vector.extract_strided_slice %43 {offsets = [0, 0], sizes = [8, 32], strides = [1, 1]} : vector<8x256xf32> to vector<8x32xf32>
    %45 = vector.extract_strided_slice %43 {offsets = [0, 32], sizes = [8, 32], strides = [1, 1]} : vector<8x256xf32> to vector<8x32xf32>
    %46 = vector.extract_strided_slice %43 {offsets = [0, 64], sizes = [8, 32], strides = [1, 1]} : vector<8x256xf32> to vector<8x32xf32>
    %47 = vector.extract_strided_slice %43 {offsets = [0, 96], sizes = [8, 32], strides = [1, 1]} : vector<8x256xf32> to vector<8x32xf32>
    %48 = arith.mulf %45, %30 : vector<8x32xf32>
    %49 = arith.mulf %44, %47 : vector<8x32xf32>
    %50 = arith.addf %48, %49 : vector<8x32xf32>
    %51 = math.tanh %50 : vector<8x32xf32>
    %52 = arith.mulf %46, %51 : vector<8x32xf32>
    %53 = tpu.concatenate %52, %29 in 1 : vector<8x32xf32>, vector<8x32xf32> -> vector<8x64xf32>
    %54 = arith.truncf %53 : vector<8x64xf32> to vector<8x64xbf16>
    %cst_22 = arith.constant dense<0.000000e+00> : vector<8x256xf32>
    %55 = tpu.matmul %54, %7, %cst_22 {dimension_numbers = #tpu.dot_dimension_numbers<[1], [0], [0], [1], [0, 0, 1, 1], [], []>} : vector<8x64xbf16>, vector<64x256xbf16>, vector<8x256xf32> -> vector<8x256xf32>
    %c8 = arith.constant 8 : index
    %c0_23 = arith.constant 0 : index
    %56 = vector.load %arg7[%c8, %c0_23] : memref<64x256xf32, #tpu.memory_space<vmem>>, vector<8x256xf32>
    %57 = arith.addf %55, %56 : vector<8x256xf32>
    %58 = math.tanh %57 : vector<8x256xf32>
    %59 = arith.negf %57 : vector<8x256xf32>
    %60 = math.exp %59 : vector<8x256xf32>
    %cst_24 = arith.constant 1.000000e+00 : f32
    %61 = vector.broadcast %cst_24 : f32 to vector<8x256xf32>
    %62 = arith.addf %61, %60 : vector<8x256xf32>
    %63 = arith.divf %61, %62 : vector<8x256xf32>
    %64 = arith.select %27, %58, %63 : vector<8x256xi1>, vector<8x256xf32>
    %65 = vector.extract_strided_slice %64 {offsets = [0, 0], sizes = [8, 32], strides = [1, 1]} : vector<8x256xf32> to vector<8x32xf32>
    %66 = vector.extract_strided_slice %64 {offsets = [0, 32], sizes = [8, 32], strides = [1, 1]} : vector<8x256xf32> to vector<8x32xf32>
    %67 = vector.extract_strided_slice %64 {offsets = [0, 64], sizes = [8, 32], strides = [1, 1]} : vector<8x256xf32> to vector<8x32xf32>
    %68 = vector.extract_strided_slice %64 {offsets = [0, 96], sizes = [8, 32], strides = [1, 1]} : vector<8x256xf32> to vector<8x32xf32>
    %69 = arith.mulf %66, %50 : vector<8x32xf32>
    %70 = arith.mulf %65, %68 : vector<8x32xf32>
    %71 = arith.addf %69, %70 : vector<8x32xf32>
    %72 = math.tanh %71 : vector<8x32xf32>
    %73 = arith.mulf %67, %72 : vector<8x32xf32>
    %74 = vector.extract_strided_slice %64 {offsets = [0, 128], sizes = [8, 32], strides = [1, 1]} : vector<8x256xf32> to vector<8x32xf32>
    %75 = vector.extract_strided_slice %64 {offsets = [0, 160], sizes = [8, 32], strides = [1, 1]} : vector<8x256xf32> to vector<8x32xf32>
    %76 = vector.extract_strided_slice %64 {offsets = [0, 192], sizes = [8, 32], strides = [1, 1]} : vector<8x256xf32> to vector<8x32xf32>
    %77 = vector.extract_strided_slice %64 {offsets = [0, 224], sizes = [8, 32], strides = [1, 1]} : vector<8x256xf32> to vector<8x32xf32>
    %78 = arith.mulf %75, %31 : vector<8x32xf32>
    %79 = arith.mulf %74, %77 : vector<8x32xf32>
    %80 = arith.addf %78, %79 : vector<8x32xf32>
    %81 = math.tanh %80 : vector<8x32xf32>
    %82 = arith.mulf %76, %81 : vector<8x32xf32>
    %83 = tpu.concatenate %73, %82 in 1 : vector<8x32xf32>, vector<8x32xf32> -> vector<8x64xf32>
    %84 = arith.truncf %83 : vector<8x64xf32> to vector<8x64xbf16>
    %cst_25 = arith.constant dense<0.000000e+00> : vector<8x256xf32>
    %85 = tpu.matmul %84, %7, %cst_25 {dimension_numbers = #tpu.dot_dimension_numbers<[1], [0], [0], [1], [0, 0, 1, 1], [], []>} : vector<8x64xbf16>, vector<64x256xbf16>, vector<8x256xf32> -> vector<8x256xf32>
    %c16 = arith.constant 16 : index
    %c0_26 = arith.constant 0 : index
    %86 = vector.load %arg7[%c16, %c0_26] : memref<64x256xf32, #tpu.memory_space<vmem>>, vector<8x256xf32>
    %87 = arith.addf %85, %86 : vector<8x256xf32>
    %88 = math.tanh %87 : vector<8x256xf32>
    %89 = arith.negf %87 : vector<8x256xf32>
    %90 = math.exp %89 : vector<8x256xf32>
    %cst_27 = arith.constant 1.000000e+00 : f32
    %91 = vector.broadcast %cst_27 : f32 to vector<8x256xf32>
    %92 = arith.addf %91, %90 : vector<8x256xf32>
    %93 = arith.divf %91, %92 : vector<8x256xf32>
    %94 = arith.select %27, %88, %93 : vector<8x256xi1>, vector<8x256xf32>
    %95 = vector.extract_strided_slice %94 {offsets = [0, 0], sizes = [8, 32], strides = [1, 1]} : vector<8x256xf32> to vector<8x32xf32>
    %96 = vector.extract_strided_slice %94 {offsets = [0, 32], sizes = [8, 32], strides = [1, 1]} : vector<8x256xf32> to vector<8x32xf32>
    %97 = vector.extract_strided_slice %94 {offsets = [0, 64], sizes = [8, 32], strides = [1, 1]} : vector<8x256xf32> to vector<8x32xf32>
    %98 = vector.extract_strided_slice %94 {offsets = [0, 96], sizes = [8, 32], strides = [1, 1]} : vector<8x256xf32> to vector<8x32xf32>
    %99 = arith.mulf %96, %71 : vector<8x32xf32>
    %100 = arith.mulf %95, %98 : vector<8x32xf32>
    %101 = arith.addf %99, %100 : vector<8x32xf32>
    %102 = math.tanh %101 : vector<8x32xf32>
    %103 = arith.mulf %97, %102 : vector<8x32xf32>
    %104 = vector.extract_strided_slice %94 {offsets = [0, 128], sizes = [8, 32], strides = [1, 1]} : vector<8x256xf32> to vector<8x32xf32>
    %105 = vector.extract_strided_slice %94 {offsets = [0, 160], sizes = [8, 32], strides = [1, 1]} : vector<8x256xf32> to vector<8x32xf32>
    %106 = vector.extract_strided_slice %94 {offsets = [0, 192], sizes = [8, 32], strides = [1, 1]} : vector<8x256xf32> to vector<8x32xf32>
    %107 = vector.extract_strided_slice %94 {offsets = [0, 224], sizes = [8, 32], strides = [1, 1]} : vector<8x256xf32> to vector<8x32xf32>
    %108 = arith.mulf %105, %80 : vector<8x32xf32>
    %109 = arith.mulf %104, %107 : vector<8x32xf32>
    %110 = arith.addf %108, %109 : vector<8x32xf32>
    %111 = math.tanh %110 : vector<8x32xf32>
    %112 = arith.mulf %106, %111 : vector<8x32xf32>
    %113 = tpu.concatenate %103, %112 in 1 : vector<8x32xf32>, vector<8x32xf32> -> vector<8x64xf32>
    %114 = arith.truncf %113 : vector<8x64xf32> to vector<8x64xbf16>
    %cst_28 = arith.constant dense<0.000000e+00> : vector<8x256xf32>
    %115 = tpu.matmul %114, %7, %cst_28 {dimension_numbers = #tpu.dot_dimension_numbers<[1], [0], [0], [1], [0, 0, 1, 1], [], []>} : vector<8x64xbf16>, vector<64x256xbf16>, vector<8x256xf32> -> vector<8x256xf32>
    %c24 = arith.constant 24 : index
    %c0_29 = arith.constant 0 : index
    %116 = vector.load %arg7[%c24, %c0_29] : memref<64x256xf32, #tpu.memory_space<vmem>>, vector<8x256xf32>
    %117 = arith.addf %115, %116 : vector<8x256xf32>
    %118 = math.tanh %117 : vector<8x256xf32>
    %119 = arith.negf %117 : vector<8x256xf32>
    %120 = math.exp %119 : vector<8x256xf32>
    %cst_30 = arith.constant 1.000000e+00 : f32
    %121 = vector.broadcast %cst_30 : f32 to vector<8x256xf32>
    %122 = arith.addf %121, %120 : vector<8x256xf32>
    %123 = arith.divf %121, %122 : vector<8x256xf32>
    %124 = arith.select %27, %118, %123 : vector<8x256xi1>, vector<8x256xf32>
    %125 = vector.extract_strided_slice %124 {offsets = [0, 0], sizes = [8, 32], strides = [1, 1]} : vector<8x256xf32> to vector<8x32xf32>
    %126 = vector.extract_strided_slice %124 {offsets = [0, 32], sizes = [8, 32], strides = [1, 1]} : vector<8x256xf32> to vector<8x32xf32>
    %127 = vector.extract_strided_slice %124 {offsets = [0, 64], sizes = [8, 32], strides = [1, 1]} : vector<8x256xf32> to vector<8x32xf32>
    %128 = vector.extract_strided_slice %124 {offsets = [0, 96], sizes = [8, 32], strides = [1, 1]} : vector<8x256xf32> to vector<8x32xf32>
    %129 = arith.mulf %126, %101 : vector<8x32xf32>
    %130 = arith.mulf %125, %128 : vector<8x32xf32>
    %131 = arith.addf %129, %130 : vector<8x32xf32>
    %132 = math.tanh %131 : vector<8x32xf32>
    %133 = arith.mulf %127, %132 : vector<8x32xf32>
    %134 = vector.extract_strided_slice %124 {offsets = [0, 128], sizes = [8, 32], strides = [1, 1]} : vector<8x256xf32> to vector<8x32xf32>
    %135 = vector.extract_strided_slice %124 {offsets = [0, 160], sizes = [8, 32], strides = [1, 1]} : vector<8x256xf32> to vector<8x32xf32>
    %136 = vector.extract_strided_slice %124 {offsets = [0, 192], sizes = [8, 32], strides = [1, 1]} : vector<8x256xf32> to vector<8x32xf32>
    %137 = vector.extract_strided_slice %124 {offsets = [0, 224], sizes = [8, 32], strides = [1, 1]} : vector<8x256xf32> to vector<8x32xf32>
    %138 = arith.mulf %135, %110 : vector<8x32xf32>
    %139 = arith.mulf %134, %137 : vector<8x32xf32>
    %140 = arith.addf %138, %139 : vector<8x32xf32>
    %141 = math.tanh %140 : vector<8x32xf32>
    %142 = arith.mulf %136, %141 : vector<8x32xf32>
    %143 = tpu.concatenate %133, %142 in 1 : vector<8x32xf32>, vector<8x32xf32> -> vector<8x64xf32>
    %144 = arith.truncf %143 : vector<8x64xf32> to vector<8x64xbf16>
    %cst_31 = arith.constant dense<0.000000e+00> : vector<8x256xf32>
    %145 = tpu.matmul %144, %7, %cst_31 {dimension_numbers = #tpu.dot_dimension_numbers<[1], [0], [0], [1], [0, 0, 1, 1], [], []>} : vector<8x64xbf16>, vector<64x256xbf16>, vector<8x256xf32> -> vector<8x256xf32>
    %c32 = arith.constant 32 : index
    %c0_32 = arith.constant 0 : index
    %146 = vector.load %arg7[%c32, %c0_32] : memref<64x256xf32, #tpu.memory_space<vmem>>, vector<8x256xf32>
    %147 = arith.addf %145, %146 : vector<8x256xf32>
    %148 = math.tanh %147 : vector<8x256xf32>
    %149 = arith.negf %147 : vector<8x256xf32>
    %150 = math.exp %149 : vector<8x256xf32>
    %cst_33 = arith.constant 1.000000e+00 : f32
    %151 = vector.broadcast %cst_33 : f32 to vector<8x256xf32>
    %152 = arith.addf %151, %150 : vector<8x256xf32>
    %153 = arith.divf %151, %152 : vector<8x256xf32>
    %154 = arith.select %27, %148, %153 : vector<8x256xi1>, vector<8x256xf32>
    %155 = vector.extract_strided_slice %154 {offsets = [0, 0], sizes = [8, 32], strides = [1, 1]} : vector<8x256xf32> to vector<8x32xf32>
    %156 = vector.extract_strided_slice %154 {offsets = [0, 32], sizes = [8, 32], strides = [1, 1]} : vector<8x256xf32> to vector<8x32xf32>
    %157 = vector.extract_strided_slice %154 {offsets = [0, 64], sizes = [8, 32], strides = [1, 1]} : vector<8x256xf32> to vector<8x32xf32>
    %158 = vector.extract_strided_slice %154 {offsets = [0, 96], sizes = [8, 32], strides = [1, 1]} : vector<8x256xf32> to vector<8x32xf32>
    %159 = arith.mulf %156, %131 : vector<8x32xf32>
    %160 = arith.mulf %155, %158 : vector<8x32xf32>
    %161 = arith.addf %159, %160 : vector<8x32xf32>
    %162 = math.tanh %161 : vector<8x32xf32>
    %163 = arith.mulf %157, %162 : vector<8x32xf32>
    %164 = vector.extract_strided_slice %154 {offsets = [0, 128], sizes = [8, 32], strides = [1, 1]} : vector<8x256xf32> to vector<8x32xf32>
    %165 = vector.extract_strided_slice %154 {offsets = [0, 160], sizes = [8, 32], strides = [1, 1]} : vector<8x256xf32> to vector<8x32xf32>
    %166 = vector.extract_strided_slice %154 {offsets = [0, 192], sizes = [8, 32], strides = [1, 1]} : vector<8x256xf32> to vector<8x32xf32>
    %167 = vector.extract_strided_slice %154 {offsets = [0, 224], sizes = [8, 32], strides = [1, 1]} : vector<8x256xf32> to vector<8x32xf32>
    %168 = arith.mulf %165, %140 : vector<8x32xf32>
    %169 = arith.mulf %164, %167 : vector<8x32xf32>
    %170 = arith.addf %168, %169 : vector<8x32xf32>
    %171 = math.tanh %170 : vector<8x32xf32>
    %172 = arith.mulf %166, %171 : vector<8x32xf32>
    %173 = tpu.concatenate %163, %172 in 1 : vector<8x32xf32>, vector<8x32xf32> -> vector<8x64xf32>
    %174 = arith.truncf %173 : vector<8x64xf32> to vector<8x64xbf16>
    %cst_34 = arith.constant dense<0.000000e+00> : vector<8x256xf32>
    %175 = tpu.matmul %174, %7, %cst_34 {dimension_numbers = #tpu.dot_dimension_numbers<[1], [0], [0], [1], [0, 0, 1, 1], [], []>} : vector<8x64xbf16>, vector<64x256xbf16>, vector<8x256xf32> -> vector<8x256xf32>
    %c40 = arith.constant 40 : index
    %c0_35 = arith.constant 0 : index
    %176 = vector.load %arg7[%c40, %c0_35] : memref<64x256xf32, #tpu.memory_space<vmem>>, vector<8x256xf32>
    %177 = arith.addf %175, %176 : vector<8x256xf32>
    %178 = math.tanh %177 : vector<8x256xf32>
    %179 = arith.negf %177 : vector<8x256xf32>
    %180 = math.exp %179 : vector<8x256xf32>
    %cst_36 = arith.constant 1.000000e+00 : f32
    %181 = vector.broadcast %cst_36 : f32 to vector<8x256xf32>
    %182 = arith.addf %181, %180 : vector<8x256xf32>
    %183 = arith.divf %181, %182 : vector<8x256xf32>
    %184 = arith.select %27, %178, %183 : vector<8x256xi1>, vector<8x256xf32>
    %185 = vector.extract_strided_slice %184 {offsets = [0, 0], sizes = [8, 32], strides = [1, 1]} : vector<8x256xf32> to vector<8x32xf32>
    %186 = vector.extract_strided_slice %184 {offsets = [0, 32], sizes = [8, 32], strides = [1, 1]} : vector<8x256xf32> to vector<8x32xf32>
    %187 = vector.extract_strided_slice %184 {offsets = [0, 64], sizes = [8, 32], strides = [1, 1]} : vector<8x256xf32> to vector<8x32xf32>
    %188 = vector.extract_strided_slice %184 {offsets = [0, 96], sizes = [8, 32], strides = [1, 1]} : vector<8x256xf32> to vector<8x32xf32>
    %189 = arith.mulf %186, %161 : vector<8x32xf32>
    %190 = arith.mulf %185, %188 : vector<8x32xf32>
    %191 = arith.addf %189, %190 : vector<8x32xf32>
    %192 = math.tanh %191 : vector<8x32xf32>
    %193 = arith.mulf %187, %192 : vector<8x32xf32>
    %194 = vector.extract_strided_slice %184 {offsets = [0, 128], sizes = [8, 32], strides = [1, 1]} : vector<8x256xf32> to vector<8x32xf32>
    %195 = vector.extract_strided_slice %184 {offsets = [0, 160], sizes = [8, 32], strides = [1, 1]} : vector<8x256xf32> to vector<8x32xf32>
    %196 = vector.extract_strided_slice %184 {offsets = [0, 192], sizes = [8, 32], strides = [1, 1]} : vector<8x256xf32> to vector<8x32xf32>
    %197 = vector.extract_strided_slice %184 {offsets = [0, 224], sizes = [8, 32], strides = [1, 1]} : vector<8x256xf32> to vector<8x32xf32>
    %198 = arith.mulf %195, %170 : vector<8x32xf32>
    %199 = arith.mulf %194, %197 : vector<8x32xf32>
    %200 = arith.addf %198, %199 : vector<8x32xf32>
    %201 = math.tanh %200 : vector<8x32xf32>
    %202 = arith.mulf %196, %201 : vector<8x32xf32>
    %203 = tpu.concatenate %193, %202 in 1 : vector<8x32xf32>, vector<8x32xf32> -> vector<8x64xf32>
    %204 = arith.truncf %203 : vector<8x64xf32> to vector<8x64xbf16>
    %cst_37 = arith.constant dense<0.000000e+00> : vector<8x256xf32>
    %205 = tpu.matmul %204, %7, %cst_37 {dimension_numbers = #tpu.dot_dimension_numbers<[1], [0], [0], [1], [0, 0, 1, 1], [], []>} : vector<8x64xbf16>, vector<64x256xbf16>, vector<8x256xf32> -> vector<8x256xf32>
    %c48 = arith.constant 48 : index
    %c0_38 = arith.constant 0 : index
    %206 = vector.load %arg7[%c48, %c0_38] : memref<64x256xf32, #tpu.memory_space<vmem>>, vector<8x256xf32>
    %207 = arith.addf %205, %206 : vector<8x256xf32>
    %208 = math.tanh %207 : vector<8x256xf32>
    %209 = arith.negf %207 : vector<8x256xf32>
    %210 = math.exp %209 : vector<8x256xf32>
    %cst_39 = arith.constant 1.000000e+00 : f32
    %211 = vector.broadcast %cst_39 : f32 to vector<8x256xf32>
    %212 = arith.addf %211, %210 : vector<8x256xf32>
    %213 = arith.divf %211, %212 : vector<8x256xf32>
    %214 = arith.select %27, %208, %213 : vector<8x256xi1>, vector<8x256xf32>
    %215 = vector.extract_strided_slice %214 {offsets = [0, 0], sizes = [8, 32], strides = [1, 1]} : vector<8x256xf32> to vector<8x32xf32>
    %216 = vector.extract_strided_slice %214 {offsets = [0, 32], sizes = [8, 32], strides = [1, 1]} : vector<8x256xf32> to vector<8x32xf32>
    %217 = vector.extract_strided_slice %214 {offsets = [0, 64], sizes = [8, 32], strides = [1, 1]} : vector<8x256xf32> to vector<8x32xf32>
    %218 = vector.extract_strided_slice %214 {offsets = [0, 96], sizes = [8, 32], strides = [1, 1]} : vector<8x256xf32> to vector<8x32xf32>
    %219 = arith.mulf %216, %191 : vector<8x32xf32>
    %220 = arith.mulf %215, %218 : vector<8x32xf32>
    %221 = arith.addf %219, %220 : vector<8x32xf32>
    %222 = math.tanh %221 : vector<8x32xf32>
    %223 = arith.mulf %217, %222 : vector<8x32xf32>
    %224 = vector.extract_strided_slice %214 {offsets = [0, 128], sizes = [8, 32], strides = [1, 1]} : vector<8x256xf32> to vector<8x32xf32>
    %225 = vector.extract_strided_slice %214 {offsets = [0, 160], sizes = [8, 32], strides = [1, 1]} : vector<8x256xf32> to vector<8x32xf32>
    %226 = vector.extract_strided_slice %214 {offsets = [0, 192], sizes = [8, 32], strides = [1, 1]} : vector<8x256xf32> to vector<8x32xf32>
    %227 = vector.extract_strided_slice %214 {offsets = [0, 224], sizes = [8, 32], strides = [1, 1]} : vector<8x256xf32> to vector<8x32xf32>
    %228 = arith.mulf %225, %200 : vector<8x32xf32>
    %229 = arith.mulf %224, %227 : vector<8x32xf32>
    %230 = arith.addf %228, %229 : vector<8x32xf32>
    %231 = math.tanh %230 : vector<8x32xf32>
    %232 = arith.mulf %226, %231 : vector<8x32xf32>
    %233 = tpu.concatenate %223, %232 in 1 : vector<8x32xf32>, vector<8x32xf32> -> vector<8x64xf32>
    %234 = arith.truncf %233 : vector<8x64xf32> to vector<8x64xbf16>
    %cst_40 = arith.constant dense<0.000000e+00> : vector<8x256xf32>
    %235 = tpu.matmul %234, %7, %cst_40 {dimension_numbers = #tpu.dot_dimension_numbers<[1], [0], [0], [1], [0, 0, 1, 1], [], []>} : vector<8x64xbf16>, vector<64x256xbf16>, vector<8x256xf32> -> vector<8x256xf32>
    %c56 = arith.constant 56 : index
    %c0_41 = arith.constant 0 : index
    %236 = vector.load %arg7[%c56, %c0_41] : memref<64x256xf32, #tpu.memory_space<vmem>>, vector<8x256xf32>
    %237 = arith.addf %235, %236 : vector<8x256xf32>
    %238 = math.tanh %237 : vector<8x256xf32>
    %239 = arith.negf %237 : vector<8x256xf32>
    %240 = math.exp %239 : vector<8x256xf32>
    %cst_42 = arith.constant 1.000000e+00 : f32
    %241 = vector.broadcast %cst_42 : f32 to vector<8x256xf32>
    %242 = arith.addf %241, %240 : vector<8x256xf32>
    %243 = arith.divf %241, %242 : vector<8x256xf32>
    %244 = arith.select %27, %238, %243 : vector<8x256xi1>, vector<8x256xf32>
    %245 = vector.extract_strided_slice %244 {offsets = [0, 0], sizes = [8, 32], strides = [1, 1]} : vector<8x256xf32> to vector<8x32xf32>
    %246 = vector.extract_strided_slice %244 {offsets = [0, 32], sizes = [8, 32], strides = [1, 1]} : vector<8x256xf32> to vector<8x32xf32>
    %247 = vector.extract_strided_slice %244 {offsets = [0, 64], sizes = [8, 32], strides = [1, 1]} : vector<8x256xf32> to vector<8x32xf32>
    %248 = vector.extract_strided_slice %244 {offsets = [0, 96], sizes = [8, 32], strides = [1, 1]} : vector<8x256xf32> to vector<8x32xf32>
    %249 = arith.mulf %246, %221 : vector<8x32xf32>
    %250 = arith.mulf %245, %248 : vector<8x32xf32>
    %251 = arith.addf %249, %250 : vector<8x32xf32>
    %252 = math.tanh %251 : vector<8x32xf32>
    %253 = arith.mulf %247, %252 : vector<8x32xf32>
    %254 = vector.extract_strided_slice %244 {offsets = [0, 128], sizes = [8, 32], strides = [1, 1]} : vector<8x256xf32> to vector<8x32xf32>
    %255 = vector.extract_strided_slice %244 {offsets = [0, 160], sizes = [8, 32], strides = [1, 1]} : vector<8x256xf32> to vector<8x32xf32>
    %256 = vector.extract_strided_slice %244 {offsets = [0, 192], sizes = [8, 32], strides = [1, 1]} : vector<8x256xf32> to vector<8x32xf32>
    %257 = vector.extract_strided_slice %244 {offsets = [0, 224], sizes = [8, 32], strides = [1, 1]} : vector<8x256xf32> to vector<8x32xf32>
    %258 = arith.mulf %255, %230 : vector<8x32xf32>
    %259 = arith.mulf %254, %257 : vector<8x32xf32>
    %260 = arith.addf %258, %259 : vector<8x32xf32>
    %261 = math.tanh %260 : vector<8x32xf32>
    %262 = arith.mulf %256, %261 : vector<8x32xf32>
    %263 = tpu.concatenate %253, %262 in 1 : vector<8x32xf32>, vector<8x32xf32> -> vector<8x64xf32>
    %264 = arith.truncf %263 : vector<8x64xf32> to vector<8x64xbf16>
    %cst_43 = arith.constant dense<0.000000e+00> : vector<8x256xf32>
    %265 = tpu.matmul %264, %7, %cst_43 {dimension_numbers = #tpu.dot_dimension_numbers<[1], [0], [0], [1], [0, 0, 1, 1], [], []>} : vector<8x64xbf16>, vector<64x256xbf16>, vector<8x256xf32> -> vector<8x256xf32>
    %266 = vector.broadcast %8 : vector<1x256xf32> to vector<8x256xf32>
    %267 = arith.addf %265, %266 : vector<8x256xf32>
    %268 = math.tanh %267 : vector<8x256xf32>
    %269 = arith.negf %267 : vector<8x256xf32>
    %270 = math.exp %269 : vector<8x256xf32>
    %cst_44 = arith.constant 1.000000e+00 : f32
    %271 = vector.broadcast %cst_44 : f32 to vector<8x256xf32>
    %272 = arith.addf %271, %270 : vector<8x256xf32>
    %273 = arith.divf %271, %272 : vector<8x256xf32>
    %274 = arith.select %27, %268, %273 : vector<8x256xi1>, vector<8x256xf32>
    %275 = vector.extract_strided_slice %274 {offsets = [0, 128], sizes = [8, 32], strides = [1, 1]} : vector<8x256xf32> to vector<8x32xf32>
    %276 = vector.extract_strided_slice %274 {offsets = [0, 160], sizes = [8, 32], strides = [1, 1]} : vector<8x256xf32> to vector<8x32xf32>
    %277 = vector.extract_strided_slice %274 {offsets = [0, 192], sizes = [8, 32], strides = [1, 1]} : vector<8x256xf32> to vector<8x32xf32>
    %278 = vector.extract_strided_slice %274 {offsets = [0, 224], sizes = [8, 32], strides = [1, 1]} : vector<8x256xf32> to vector<8x32xf32>
    %279 = arith.mulf %276, %260 : vector<8x32xf32>
    %280 = arith.mulf %275, %278 : vector<8x32xf32>
    %281 = arith.addf %279, %280 : vector<8x32xf32>
    %282 = math.tanh %281 : vector<8x32xf32>
    %283 = arith.mulf %277, %282 : vector<8x32xf32>
    %284 = arith.truncf %283 : vector<8x32xf32> to vector<8x32xbf16>
    %c0_45 = arith.constant 0 : index
    %c0_46 = arith.constant 0 : index
    %285 = vector.load %arg4[%c0_45, %c0_46] : memref<32x128xbf16, #tpu.memory_space<vmem>>, vector<32x128xbf16>
    %cst_47 = arith.constant dense<0.000000e+00> : vector<8x128xf32>
    %286 = tpu.matmul %284, %285, %cst_47 {dimension_numbers = #tpu.dot_dimension_numbers<[1], [0], [0], [1], [0, 0, 1, 1], [], []>} : vector<8x32xbf16>, vector<32x128xbf16>, vector<8x128xf32> -> vector<8x128xf32>
    %c0_48 = arith.constant 0 : index
    %c0_49 = arith.constant 0 : index
    %287 = vector.load %arg5[%c0_48, %c0_49] : memref<1x128xf32, #tpu.memory_space<vmem>>, vector<1x128xf32>
    %288 = vector.broadcast %287 : vector<1x128xf32> to vector<8x128xf32>
    %289 = arith.addf %286, %288 : vector<8x128xf32>
    %c0_50 = arith.constant 0 : index
    %c0_51 = arith.constant 0 : index
    %290 = vector.load %arg6[%c0_50, %c0_51] : memref<8x128xf32, #tpu.memory_space<vmem>>, vector<8x128xf32>
    tpu.vector_store %arg6[%c0_50, %c0_51], %289 {strides = array<i32>} : memref<8x128xf32, #tpu.memory_space<vmem>>, vector<8x128xf32>,
    return
  }
}

</mosaic_0001>

<bundles_post_ra>
// kernel: forward.1
= control target key start
LH: loop header
LB: loop body
LE: loop exit
PB: predicated region body
PF: predicated region fallthrough
CT: control target
= control target key end

     0   :  { %v1438_v1 = vmov 0   ;;  %vm76_vm0 = vcmask 130048   ;;  %v1439_v12 = vmov 0.0|0.0   ;;  %v36_v13 = vlaneseq  ;;  %s1440_s19 = smov 32   ;;  %s1441_s20 = smov 64   ;;  %s1859_s3 = inlined_call_operand.vmem [shape: bf16[64,256], index: 3, kind: input, shape index: {}]   ;;  %s1860_s1 = inlined_call_operand.vmem [shape: bf16[16,256], index: 1, kind: input, shape index: {}]   ;;  %s1861_s0 = inlined_call_operand.vmem [shape: bf16[64,16], index: 0, kind: input, shape index: {}]   ;;  %s1862_s2 = inlined_call_operand.vmem [shape: f32[1,256], index: 2, kind: input, shape index: {}]   ;;  %s1863_s4 = inlined_call_operand.vmem [shape: bf16[32,128], index: 4, kind: input, shape index: {}]   ;;  %s1864_s5 = inlined_call_operand.vmem [shape: f32[1,128], index: 5, kind: input, shape index: {}]   ;;  %s1865_s6 = inlined_call_operand.vmem [shape: f32[8,128], index: 6, kind: output, shape index: {}]  }
   0x1   :  { %v1483_v0 = vld [vmem:[%s1859_s3 + $0x34] ss:$8 sps:$4 sm:$0xff]   ;;  %121 = vmatprep.mubr.bf16.mxu0 %v1438_v1  ;;  %294 = vmatprep.mubr.bf16.mxu1 %v1438_v1  ;;  %v1490_v2 = vld [vmem:[%s1859_s3 + $0x30] ss:$8 sps:$4 sm:$0xff]   ;;  %v1292_v3 = vld [vmem:[%s1860_s1 + $0x4] ss:$8 sps:$4 sm:$0xff]  }
   0x2   :  { %270 = vmatprep.subr.bf16.mxu1 %v1483_v0  ;;  %v1500_v4 = vld [vmem:[%s1859_s3 + $0x24] ss:$8 sps:$4 sm:$0xff]   ;;  %v1296_v5 = vld [vmem:[%s1860_s1] ss:$8 sps:$4 sm:$0xff]   ;;  %103 = vmatprep.subr.bf16.mxu0 %v1292_v3  ;;  %v1517_v8 = vld [vmem:[%s1859_s3 + $0x14] ss:$8 sps:$4 sm:$0xff]  }
   0x3   :  { %271 = vmatpush1.bf16.msra.mxu1 %v1490_v2  ;;  %v1508_v6 = vld [vmem:[%s1859_s3 + $0x20] ss:$8 sps:$4 sm:$0xff]   ;;  %104 = vmatpush1.bf16.msra.mxu0 %v1296_v5  ;;  %v1524_v9 = vld [vmem:[%s1859_s3 + $0x10] ss:$8 sps:$4 sm:$0xff]   ;;  %v1529_v10 = vld [vmem:[%s1859_s3 + $0x4] ss:$8 sps:$4 sm:$0xff]  }
   0x4   :  { %v1298_v7 = vld [vmem:[%s1861_s0] sm:$0xff]   ;;  %272 = vmatprep.subr.bf16.mxu1 %v1500_v4  ;;  %453 = vmatprep.subr.bf16.mxu0 %v1483_v0  ;;  %v1560_v14 = vshrl.u32 %v36_v13, 7  ;;  %v1569_v29 = vand.u32 127, %v36_v13  ;;  %vm331_vm2 = vcmask 261120   ;;  %vm258_vm3 = vcmask 523264   ;;  %s1442_s27 = smov 96  }
   0x5   :  { %v1540_v11 = vld [vmem:[%s1859_s3] ss:$8 sps:$4 sm:$0xff]   ;;  %vm1444_vm5 = vmmov 0  }
   0x6   :  { %1231 = vmatmul.mubr.msk.bf16.vlgmr.msra.gmra.mxu0 %vm76_vm0, %v1298_v7  ;;  %v38_v15 = vsub.s32 0, %v1560_v14  ;;  %v34_v16 = vld [vmem:[%s1862_s2] sm:$0x3]  ;;  %vm214_vm1 = vcmp.ge.s32.totalorder %v1569_v29, 96  ;;  %v42_v44 = vsub.s32 1, %v1560_v14  ;;  %v189_v62 = vadd.s32 128, %v1569_v29 }
   0x7   :  { %273 = vmatpush1.bf16.msra.mxu1 %v1508_v6  ;;  %454 = vmatpush1.bf16.msra.mxu0 %v1490_v2  ;;  %v1309_v7 = vld [vmem:[%s1863_s4] sm:$0xff]  }
   0x8   :  { %274 = vmatprep.subr.bf16.mxu1 %v1517_v8  ;;  %131 = vmatprep.mubr.bf16.mxu0 %v1438_v1  ;;  %v1566_v19 = vrot.slane %v34_v16, %v38_v15  ;;  %v1595_v46 = vrot.slane %v34_v16, %v42_v44  ;;  %v201_v63 = vand.u32 127, %v189_v62 }
   0x9   :  { %455 = vmatprep.subr.bf16.mxu0 %v1500_v4 }
   0xa   :  { %vm1600_vm4 = vcmp.ge.s32.totalorder %v201_v63, 96 }
   0xb   :  { %275 = vmatpush1.bf16.msra.mxu1 %v1524_v9  ;;  %456 = vmatpush1.bf16.msra.mxu0 %v1508_v6 }
   0xc   :  { %276 = vmatprep.subr.bf16.mxu1 %v1529_v10  ;;  %457 = vmatprep.subr.bf16.mxu0 %v1517_v8 }
   0xf   :  { %277 = vmatpush1.bf16.msra.mxu1 %v1540_v11  ;;  %458 = vmatpush1.bf16.msra.mxu0 %v1524_v9 }
  0x10   :  { %347 = vmatprep.subr.bf16.mxu1 %v1483_v0  ;;  %459 = vmatprep.subr.bf16.mxu0 %v1529_v10 }
  0x12   :  { %295 = vmatmul.mubr.bf16.vlgmr.msra.gmra.mxu1 %v1439_v12 }
  0x13   :  { %348 = vmatpush1.bf16.msra.mxu1 %v1490_v2  ;;  %371 = vmatprep.mubr.bf16.mxu1 %v1438_v1 }
  0x14   :  { %349 = vmatprep.subr.bf16.mxu1 %v1500_v4  ;;  %460 = vmatpush1.bf16.msra.mxu0 %v1540_v11 }
  0x15   :  { %665 = vmatprep.subr.bf16.mxu0 %v1483_v0 }
  0x17   :  { %350 = vmatpush1.bf16.msra.mxu1 %v1508_v6 }
  0x18   :  { %351 = vmatprep.subr.bf16.mxu1 %v1517_v8 }
  0x1b   :  { %352 = vmatpush1.bf16.msra.mxu1 %v1524_v9 }
  0x1c   :  { %353 = vmatprep.subr.bf16.mxu1 %v1529_v10 }
  0x1f   :  { %354 = vmatpush1.bf16.msra.mxu1 %v1540_v11 }
  0x20   :  { %559 = vmatprep.subr.bf16.mxu1 %v1483_v0 }
  0xc6   :  { %v123_v17 = vpop.f32.mrf.mxu0 }
  0xc7   :  { %v124_v20 = vadd.f32 %v123_v17, %v1566_v19 }
  0xc8   :  { %v125_v18 = vpop.f32.mrf.mxu0 }
  0xca   :  { %v127_v45 = vpop.f32.mrf.mxu0 }
  0xcb   :  { %v128_v48 = vadd.f32 %v127_v45, %v1566_v19 }
  0xcc   :  { %v129_v47 = vpop.f32.mrf.mxu0 }
  0xcd   :  { %v130_v50 = vadd.f32 %v129_v47, %v1595_v46 }
  0xd2   :  { %v296_v21 = vpop.f32.mrf.mxu1 }
  0xd3   :  { %v297_v22 = vadd.f32 %v296_v21, %v124_v20 }
  0xd4   :  { %v298_v23 = vpop.f32.mrf.mxu1 }
  0xd5   :  { %v1243_v24 = vmul.f32 -1.442695, %v297_v22 }
  0xd6   :  { %v299_v25 = vpop.f32.mrf.mxu1 }
  0xd7   :  { %1310 = vpow2.f32 %v1243_v24 }
  0xd8   :  { %v300_v26 = vpop.f32.mrf.mxu1  ;;  %1312 = vtanh.f32 %v297_v22 }
  0xe4   :  { %v1311_v27 = vpop.eup %1310 }
  0xe5   :  { %v306_v28 = vadd.f32 1.0, %v1311_v27  ;;  %v1313_v30 = vpop.eup %1312 }
  0xe7   :  { %1314 = vrcp.f32 %v306_v28  ;;  %v1305_v28 = vld [vmem:[%s1861_s0 + $0x8] sm:$0xff]  }
  0xe8   :  { %1232 = vmatmul.mubr.msk.bf16.gmra.mxu0 %vm76_vm0, %v1305_v28 }
  0xe9   :  { %141 = vmatprep.mubr.bf16.mxu0 %v1438_v1 }
  0xf4   :  { %v1315_v31 = vpop.eup %1314 }
  0xf5   :  { %v309_v32 = vsel %vm214_vm1, %v1313_v30, %v1315_v31  ;;  %v1306_v30 = vld [vmem:[%s1861_s0 + $0x10] sm:$0xff]  }
  0xf6   :  { %312 = vrot.lane.b32.xlu0 %v309_v32, %s1440_s19  ;;  %v310_v35 = vmul.f32 0.0, %v309_v32  ;;  %1233 = vmatmul.mubr.msk.bf16.gmra.mxu0 %vm76_vm0, %v1306_v30 }
  0xf7   :  { %151 = vmatprep.mubr.bf16.mxu0 %v1438_v1 }
 0x168   :  { %v313_v33 = vpop.permute.xlu0 %312 }
 0x169   :  { %v315_v34 = vmul.f32 %v313_v33, %v309_v32  ;;  %v1307_v33 = vld [vmem:[%s1861_s0 + $0x18] sm:$0xff]  }
 0x16a   :  { %1234 = vmatmul.mubr.msk.bf16.gmra.mxu0 %vm76_vm0, %v1307_v33 }
 0x16b   :  { %317 = vrot.lane.b32.xlu0 %v315_v34, %s1440_s19  ;;  %477 = vmatprep.mubr.bf16.mxu0 %v1438_v1 }
 0x1dd   :  { %v318_v36 = vpop.permute.xlu0 %317 }
 0x1de   :  { %v1576_v37 = vadd.f32 %v318_v36, %v310_v35 }
 0x1e0   :  { %1316 = vtanh.f32 %v1576_v37 }
 0x1ed   :  { %v1317_v38 = vpop.eup %1316 }
 0x1ee   :  { %323 = vrot.lane.b32.xlu1 %v1317_v38, %s1440_s19 }
 0x260   :  { %v324_v39 = vpop.permute.xlu1 %323 }
 0x261   :  { %v326_v40 = vmul.f32 %v324_v39, %v309_v32 }
 0x263   :  { %328 = vrot.lane.b32.xlu1 %v326_v40, %s1441_s20 }
 0x2d5   :  { %v329_v41 = vpop.permute.xlu1 %328 }
 0x2d6   :  { %v332_v42 = vsel %vm331_vm2, %v329_v41, 0.0 }
 0x2d7   :  { %v333_v43 = vpack.c.bf16 %v332_v42, %v332_v42  ;;  %v133_v42 = vpop.f32.mrf.mxu0 }
 0x2d9   :  { %1244 = vmatmul.mubr.msk.bf16.vlgmr.msra.gmra.mxu1 %vm258_vm3, %v333_v43  ;;  %v135_v43 = vpop.f32.mrf.mxu0 }
 0x2da   :  { %560 = vmatpush1.bf16.msra.mxu1 %v1490_v2  ;;  %583 = vmatprep.mubr.bf16.mxu1 %v1438_v1 }
 0x2db   :  { %561 = vmatprep.subr.bf16.mxu1 %v1500_v4  ;;  %v1649_v45 = vpop.f32.mrf.mxu0 }
 0x2dd   :  { %v1651_v47 = vpop.f32.mrf.mxu0 }
 0x2de   :  { %562 = vmatpush1.bf16.msra.mxu1 %v1508_v6 }
 0x2df   :  { %563 = vmatprep.subr.bf16.mxu1 %v1517_v8 }
 0x2e2   :  { %564 = vmatpush1.bf16.msra.mxu1 %v1524_v9 }
 0x2e3   :  { %565 = vmatprep.subr.bf16.mxu1 %v1529_v10 }
 0x2e6   :  { %566 = vmatpush1.bf16.msra.mxu1 %v1540_v11 }
 0x2e7   :  { %771 = vmatprep.subr.bf16.mxu1 %v1483_v0 }
 0x399   :  { %v373_v49 = vpop.f32.mrf.mxu1 }
 0x39a   :  { %v374_v51 = vadd.f32 %v373_v49, %v128_v48  ;;  %v1653_v48 = vpop.f32.mrf.mxu0 }
 0x39b   :  { %v375_v52 = vpop.f32.mrf.mxu1 }
 0x39c   :  { %v1245_v53 = vmul.f32 -1.442695, %v374_v51  ;;  %v376_v54 = vadd.f32 %v375_v52, %v130_v50  ;;  %v1655_v49 = vpop.f32.mrf.mxu0 }
 0x39d   :  { %v377_v55 = vpop.f32.mrf.mxu1 }
 0x39e   :  { %1318 = vpow2.f32 %v1245_v53  ;;  %v1246_v56 = vmul.f32 -1.442695, %v376_v54  ;;  %v1657_v50 = vpop.f32.mrf.mxu0 }
 0x39f   :  { %v378_v57 = vpop.f32.mrf.mxu1 }
 0x3a0   :  { %1320 = vpow2.f32 %v1246_v56  ;;  %v134_v56 = vadd.f32 %v133_v42, %v1566_v19 }
 0x3a1   :  { %1322 = vtanh.f32 %v374_v51  ;;  %v1659_v51 = vpop.f32.mrf.mxu0 }
 0x3a3   :  { %v1661_v52 = vpop.f32.mrf.mxu0 }
 0x3a5   :  { %v1663_v53 = vpop.f32.mrf.mxu0 }
 0x3ab   :  { %v1319_v58 = vpop.eup %1318 }
 0x3ac   :  { %v388_v59 = vadd.f32 1.0, %v1319_v58  ;;  %v136_v58 = vadd.f32 %v135_v43, %v1595_v46 }
 0x3ad   :  { %v1321_v60 = vpop.eup %1320 }
 0x3ae   :  { %1324 = vrcp.f32 %v388_v59  ;;  %v389_v61 = vadd.f32 1.0, %v1321_v60  ;;  %v1323_v3 = vpop.eup %1322 }
 0x3af   :  { %1326 = vtanh.f32 %v376_v54  ;;  %v1665_v54 = vpop.f32.mrf.mxu0 }
 0x3b0   :  { %1328 = vrcp.f32 %v389_v61 }
 0x3b1   :  { %v1667_v55 = vpop.f32.mrf.mxu0 }
 0x3bb   :  { %v1325_v5 = vpop.eup %1324 }
 0x3bc   :  { %v1327_v12 = vpop.eup %1326  ;;  %v394_v13 = vsel %vm214_vm1, %v1323_v3, %v1325_v5 }
 0x3bd   :  { %v1329_v15 = vpop.eup %1328  ;;  %398 = vrot.lane.b32.xlu0 %v394_v13, %s1440_s19  ;;  %v396_v22 = vmul.f32 %v394_v13, %v1576_v37 }
 0x3be   :  { %v395_v16 = vsel %vm1600_vm4, %v1327_v12, %v1329_v15 }
 0x3bf   :  { %415 = vrot.lane.b32.xlu1 %v395_v16, %s1440_s19  ;;  %v413_v25 = vmul.f32 0.0, %v395_v16 }
 0x42f   :  { %v399_v17 = vpop.permute.xlu0 %398 }
 0x430   :  { %v401_v18 = vmul.f32 %v399_v17, %v394_v13 }
 0x431   :  { %v416_v20 = vpop.permute.xlu1 %415 }
 0x432   :  { %v418_v21 = vmul.f32 %v416_v20, %v395_v16  ;;  %403 = vrot.lane.b32.xlu0 %v401_v18, %s1440_s19 }
 0x434   :  { %420 = vrot.lane.b32.xlu1 %v418_v21, %s1440_s19 }
 0x4a4   :  { %v404_v23 = vpop.permute.xlu0 %403 }
 0x4a5   :  { %v1613_v24 = vadd.f32 %v404_v23, %v396_v22 }
 0x4a6   :  { %v421_v26 = vpop.permute.xlu1 %420 }
 0x4a7   :  { %1330 = vtanh.f32 %v1613_v24  ;;  %v1616_v27 = vadd.f32 %v421_v26, %v413_v25 }
 0x4a9   :  { %1332 = vtanh.f32 %v1616_v27 }
 0x4b4   :  { %v1331_v31 = vpop.eup %1330 }
 0x4b5   :  { %409 = vrot.lane.b32.xlu0 %v1331_v31, %s1440_s19 }
 0x4b6   :  { %v1333_v32 = vpop.eup %1332 }
 0x4b7   :  { %426 = vrot.lane.b32.xlu1 %v1333_v32, %s1440_s19 }
 0x527   :  { %v410_v34 = vpop.permute.xlu0 %409 }
 0x528   :  { %v412_v35 = vmul.f32 %v410_v34, %v394_v13 }
 0x529   :  { %v427_v36 = vpop.permute.xlu1 %426 }
 0x52a   :  { %v429_v37 = vmul.f32 %v427_v36, %v395_v16  ;;  %431 = vrot.lane.b32.xlu0 %v412_v35, %s1441_s20 }
 0x52c   :  { %435 = vrot.lane.b32.xlu1 %v429_v37, %s1442_s27 }
 0x59c   :  { %v432_v38 = vpop.permute.xlu0 %431 }
 0x59e   :  { %v436_v39 = vpop.permute.xlu1 %435 }
 0x59f   :  { %v438_v40 = vsel %vm331_vm2, %v432_v38, %v436_v39 }
 0x5a0   :  { %v439_v41 = vpack.c.bf16 %v438_v40, %v438_v40 }
 0x5a2   :  { %1247 = vmatmul.mubr.msk.bf16.vlgmr.msra.gmra.mxu0 %vm258_vm3, %v439_v41 }
 0x5a3   :  { %666 = vmatpush1.bf16.msra.mxu0 %v1490_v2  ;;  %689 = vmatprep.mubr.bf16.mxu0 %v1438_v1 }
 0x5a4   :  { %667 = vmatprep.subr.bf16.mxu0 %v1500_v4 }
 0x5a7   :  { %668 = vmatpush1.bf16.msra.mxu0 %v1508_v6 }
 0x5a8   :  { %669 = vmatprep.subr.bf16.mxu0 %v1517_v8 }
 0x5ab   :  { %670 = vmatpush1.bf16.msra.mxu0 %v1524_v9 }
 0x5ac   :  { %671 = vmatprep.subr.bf16.mxu0 %v1529_v10 }
 0x5af   :  { %672 = vmatpush1.bf16.msra.mxu0 %v1540_v11 }
 0x5b0   :  { %877 = vmatprep.subr.bf16.mxu0 %v1483_v0 }
 0x662   :  { %v479_v57 = vpop.f32.mrf.mxu0 }
 0x663   :  { %v480_v59 = vadd.f32 %v479_v57, %v134_v56  ;;  %v138_v57 = vadd.f32 %v1649_v45, %v1566_v19 }
 0x664   :  { %v481_v60 = vpop.f32.mrf.mxu0 }
 0x665   :  { %v1248_v61 = vmul.f32 -1.442695, %v480_v59  ;;  %v482_v62 = vadd.f32 %v481_v60, %v136_v58 }
 0x666   :  { %v483_v63 = vpop.f32.mrf.mxu0 }
 0x667   :  { %1334 = vpow2.f32 %v1248_v61  ;;  %v1249_v3 = vmul.f32 -1.442695, %v482_v62 }
 0x668   :  { %v484_v5 = vpop.f32.mrf.mxu0 }
 0x669   :  { %1336 = vpow2.f32 %v1249_v3 }
 0x66a   :  { %1338 = vtanh.f32 %v480_v59  ;;  %v140_v59 = vadd.f32 %v1651_v47, %v1595_v46 }
 0x674   :  { %v1335_v12 = vpop.eup %1334 }
 0x675   :  { %v494_v13 = vadd.f32 1.0, %v1335_v12 }
 0x676   :  { %v1337_v15 = vpop.eup %1336 }
 0x677   :  { %1340 = vrcp.f32 %v494_v13  ;;  %v495_v16 = vadd.f32 1.0, %v1337_v15  ;;  %v1339_v17 = vpop.eup %1338 }
 0x678   :  { %1342 = vtanh.f32 %v482_v62 }
 0x679   :  { %1344 = vrcp.f32 %v495_v16 }
 0x684   :  { %v1341_v18 = vpop.eup %1340 }
 0x685   :  { %v1343_v20 = vpop.eup %1342  ;;  %v500_v21 = vsel %vm214_vm1, %v1339_v17, %v1341_v18 }
 0x686   :  { %v1345_v22 = vpop.eup %1344  ;;  %504 = vrot.lane.b32.xlu0 %v500_v21, %s1440_s19  ;;  %v502_v31 = vmul.f32 %v500_v21, %v1613_v24 }
 0x687   :  { %v501_v23 = vsel %vm1600_vm4, %v1343_v20, %v1345_v22 }
 0x688   :  { %521 = vrot.lane.b32.xlu1 %v501_v23, %s1440_s19  ;;  %v519_v34 = vmul.f32 %v501_v23, %v1616_v27 }
 0x6f8   :  { %v505_v25 = vpop.permute.xlu0 %504 }
 0x6f9   :  { %v507_v26 = vmul.f32 %v505_v25, %v500_v21 }
 0x6fa   :  { %v522_v28 = vpop.permute.xlu1 %521 }
 0x6fb   :  { %v524_v30 = vmul.f32 %v522_v28, %v501_v23  ;;  %509 = vrot.lane.b32.xlu0 %v507_v26, %s1440_s19 }
 0x6fd   :  { %526 = vrot.lane.b32.xlu1 %v524_v30, %s1440_s19 }
 0x76d   :  { %v510_v32 = vpop.permute.xlu0 %509 }
 0x76e   :  { %v1680_v33 = vadd.f32 %v510_v32, %v502_v31 }
 0x76f   :  { %v527_v35 = vpop.permute.xlu1 %526 }
 0x770   :  { %1346 = vtanh.f32 %v1680_v33  ;;  %v1684_v36 = vadd.f32 %v527_v35, %v519_v34 }
 0x772   :  { %1348 = vtanh.f32 %v1684_v36 }
 0x77d   :  { %v1347_v37 = vpop.eup %1346 }
 0x77e   :  { %515 = vrot.lane.b32.xlu0 %v1347_v37, %s1440_s19 }
 0x77f   :  { %v1349_v38 = vpop.eup %1348 }
 0x780   :  { %532 = vrot.lane.b32.xlu1 %v1349_v38, %s1440_s19 }
 0x7f0   :  { %v516_v39 = vpop.permute.xlu0 %515 }
 0x7f1   :  { %v518_v24 = vmul.f32 %v516_v39, %v500_v21 }
 0x7f2   :  { %v533_v40 = vpop.permute.xlu1 %532 }
 0x7f3   :  { %v535_v41 = vmul.f32 %v533_v40, %v501_v23  ;;  %537 = vrot.lane.b32.xlu0 %v518_v24, %s1441_s20 }
 0x7f5   :  { %541 = vrot.lane.b32.xlu1 %v535_v41, %s1442_s27 }
 0x865   :  { %v538_v27 = vpop.permute.xlu0 %537 }
 0x867   :  { %v542_v42 = vpop.permute.xlu1 %541 }
 0x868   :  { %v544_v43 = vsel %vm331_vm2, %v538_v27, %v542_v42 }
 0x869   :  { %v545_v56 = vpack.c.bf16 %v544_v43, %v544_v43 }
 0x86b   :  { %1250 = vmatmul.mubr.msk.bf16.vlgmr.msra.gmra.mxu1 %vm258_vm3, %v545_v56  ;;  %v144_v56 = vadd.f32 %v1653_v48, %v1566_v19 }
 0x86c   :  { %772 = vmatpush1.bf16.msra.mxu1 %v1490_v2  ;;  %795 = vmatprep.mubr.bf16.mxu1 %v1438_v1 }
 0x86d   :  { %773 = vmatprep.subr.bf16.mxu1 %v1500_v4 }
 0x870   :  { %774 = vmatpush1.bf16.msra.mxu1 %v1508_v6 }
 0x871   :  { %775 = vmatprep.subr.bf16.mxu1 %v1517_v8 }
 0x874   :  { %776 = vmatpush1.bf16.msra.mxu1 %v1524_v9 }
 0x875   :  { %777 = vmatprep.subr.bf16.mxu1 %v1529_v10 }
 0x878   :  { %778 = vmatpush1.bf16.msra.mxu1 %v1540_v11 }
 0x879   :  { %983 = vmatprep.subr.bf16.mxu1 %v1483_v0 }
 0x92b   :  { %v585_v58 = vpop.f32.mrf.mxu1 }
 0x92c   :  { %v586_v60 = vadd.f32 %v585_v58, %v138_v57  ;;  %v146_v58 = vadd.f32 %v1655_v49, %v1595_v46 }
 0x92d   :  { %v587_v61 = vpop.f32.mrf.mxu1 }
 0x92e   :  { %v1251_v62 = vmul.f32 -1.442695, %v586_v60  ;;  %v588_v63 = vadd.f32 %v587_v61, %v140_v59 }
 0x92f   :  { %v589_v3 = vpop.f32.mrf.mxu1 }
 0x930   :  { %1350 = vpow2.f32 %v1251_v62  ;;  %v1252_v5 = vmul.f32 -1.442695, %v588_v63 }
 0x931   :  { %v590_v12 = vpop.f32.mrf.mxu1 }
 0x932   :  { %1352 = vpow2.f32 %v1252_v5 }
 0x933   :  { %1354 = vtanh.f32 %v586_v60 }
 0x93d   :  { %v1351_v13 = vpop.eup %1350 }
 0x93e   :  { %v600_v15 = vadd.f32 1.0, %v1351_v13 }
 0x93f   :  { %v1353_v16 = vpop.eup %1352 }
 0x940   :  { %1356 = vrcp.f32 %v600_v15  ;;  %v601_v17 = vadd.f32 1.0, %v1353_v16  ;;  %v1355_v45 = vpop.eup %1354 }
 0x941   :  { %1358 = vtanh.f32 %v588_v63 }
 0x942   :  { %1360 = vrcp.f32 %v601_v17 }
 0x94d   :  { %v1357_v18 = vpop.eup %1356 }
 0x94e   :  { %v1359_v47 = vpop.eup %1358  ;;  %v606_v20 = vsel %vm214_vm1, %v1355_v45, %v1357_v18 }
 0x94f   :  { %v1361_v21 = vpop.eup %1360  ;;  %610 = vrot.lane.b32.xlu0 %v606_v20, %s1440_s19  ;;  %v608_v30 = vmul.f32 %v606_v20, %v1680_v33 }
 0x950   :  { %v607_v22 = vsel %vm1600_vm4, %v1359_v47, %v1361_v21 }
 0x951   :  { %627 = vrot.lane.b32.xlu1 %v607_v22, %s1440_s19  ;;  %v625_v34 = vmul.f32 %v607_v22, %v1684_v36 }
 0x9c1   :  { %v611_v23 = vpop.permute.xlu0 %610 }
 0x9c2   :  { %v613_v25 = vmul.f32 %v611_v23, %v606_v20 }
 0x9c3   :  { %v628_v26 = vpop.permute.xlu1 %627 }
 0x9c4   :  { %v630_v28 = vmul.f32 %v628_v26, %v607_v22  ;;  %615 = vrot.lane.b32.xlu0 %v613_v25, %s1440_s19 }
 0x9c6   :  { %632 = vrot.lane.b32.xlu1 %v630_v28, %s1440_s19 }
 0xa36   :  { %v616_v31 = vpop.permute.xlu0 %615 }
 0xa37   :  { %v1715_v32 = vadd.f32 %v616_v31, %v608_v30 }
 0xa38   :  { %v633_v35 = vpop.permute.xlu1 %632 }
 0xa39   :  { %1362 = vtanh.f32 %v1715_v32  ;;  %v1719_v37 = vadd.f32 %v633_v35, %v625_v34 }
 0xa3b   :  { %1364 = vtanh.f32 %v1719_v37 }
 0xa46   :  { %v1363_v38 = vpop.eup %1362 }
 0xa47   :  { %621 = vrot.lane.b32.xlu0 %v1363_v38, %s1440_s19 }
 0xa48   :  { %v1365_v39 = vpop.eup %1364 }
 0xa49   :  { %638 = vrot.lane.b32.xlu1 %v1365_v39, %s1440_s19 }
 0xab9   :  { %v622_v24 = vpop.permute.xlu0 %621 }
 0xaba   :  { %v624_v33 = vmul.f32 %v622_v24, %v606_v20 }
 0xabb   :  { %v639_v40 = vpop.permute.xlu1 %638 }
 0xabc   :  { %v641_v41 = vmul.f32 %v639_v40, %v607_v22  ;;  %643 = vrot.lane.b32.xlu0 %v624_v33, %s1441_s20 }
 0xabe   :  { %647 = vrot.lane.b32.xlu1 %v641_v41, %s1442_s27 }
 0xb2e   :  { %v644_v36 = vpop.permute.xlu0 %643 }
 0xb30   :  { %v648_v27 = vpop.permute.xlu1 %647 }
 0xb31   :  { %v650_v42 = vsel %vm331_vm2, %v644_v36, %v648_v27  ;;  %v148_v36 = vadd.f32 %v1657_v50, %v1566_v19 }
 0xb32   :  { %v651_v43 = vpack.c.bf16 %v650_v42, %v650_v42  ;;  %v150_v42 = vadd.f32 %v1659_v51, %v1595_v46 }
 0xb34   :  { %1253 = vmatmul.mubr.msk.bf16.vlgmr.msra.gmra.mxu0 %vm258_vm3, %v651_v43 }
 0xb35   :  { %878 = vmatpush1.bf16.msra.mxu0 %v1490_v2  ;;  %901 = vmatprep.mubr.bf16.mxu0 %v1438_v1 }
 0xb36   :  { %879 = vmatprep.subr.bf16.mxu0 %v1500_v4 }
 0xb39   :  { %880 = vmatpush1.bf16.msra.mxu0 %v1508_v6 }
 0xb3a   :  { %881 = vmatprep.subr.bf16.mxu0 %v1517_v8 }
 0xb3d   :  { %882 = vmatpush1.bf16.msra.mxu0 %v1524_v9 }
 0xb3e   :  { %883 = vmatprep.subr.bf16.mxu0 %v1529_v10 }
 0xb41   :  { %884 = vmatpush1.bf16.msra.mxu0 %v1540_v11 }
 0xb42   :  { %1093 = vmatprep.subr.bf16.mxu0 %v1483_v0 }
 0xbf4   :  { %v691_v57 = vpop.f32.mrf.mxu0 }
 0xbf5   :  { %v692_v59 = vadd.f32 %v691_v57, %v144_v56 }
 0xbf6   :  { %v693_v60 = vpop.f32.mrf.mxu0 }
 0xbf7   :  { %v1254_v61 = vmul.f32 -1.442695, %v692_v59  ;;  %v694_v62 = vadd.f32 %v693_v60, %v146_v58 }
 0xbf8   :  { %v695_v63 = vpop.f32.mrf.mxu0 }
 0xbf9   :  { %1366 = vpow2.f32 %v1254_v61  ;;  %v1255_v3 = vmul.f32 -1.442695, %v694_v62 }
 0xbfa   :  { %v696_v5 = vpop.f32.mrf.mxu0 }
 0xbfb   :  { %1368 = vpow2.f32 %v1255_v3 }
 0xbfc   :  { %1370 = vtanh.f32 %v692_v59 }
 0xc06   :  { %v1367_v12 = vpop.eup %1366 }
 0xc07   :  { %v706_v13 = vadd.f32 1.0, %v1367_v12 }
 0xc08   :  { %v1369_v15 = vpop.eup %1368 }
 0xc09   :  { %1372 = vrcp.f32 %v706_v13  ;;  %v707_v0 = vadd.f32 1.0, %v1369_v15  ;;  %v1371_v48 = vpop.eup %1370 }
 0xc0a   :  { %1374 = vtanh.f32 %v694_v62 }
 0xc0b   :  { %1376 = vrcp.f32 %v707_v0 }
 0xc16   :  { %v1373_v16 = vpop.eup %1372 }
 0xc17   :  { %v1375_v49 = vpop.eup %1374  ;;  %v712_v17 = vsel %vm214_vm1, %v1371_v48, %v1373_v16 }
 0xc18   :  { %v1377_v45 = vpop.eup %1376  ;;  %716 = vrot.lane.b32.xlu0 %v712_v17, %s1440_s19  ;;  %v714_v23 = vmul.f32 %v712_v17, %v1715_v32 }
 0xc19   :  { %v713_v18 = vsel %vm1600_vm4, %v1375_v49, %v1377_v45 }
 0xc1a   :  { %733 = vrot.lane.b32.xlu1 %v713_v18, %s1440_s19  ;;  %v731_v28 = vmul.f32 %v713_v18, %v1719_v37 }
 0xc8a   :  { %v717_v47 = vpop.permute.xlu0 %716 }
 0xc8b   :  { %v719_v20 = vmul.f32 %v717_v47, %v712_v17 }
 0xc8c   :  { %v734_v21 = vpop.permute.xlu1 %733 }
 0xc8d   :  { %v736_v22 = vmul.f32 %v734_v21, %v713_v18  ;;  %721 = vrot.lane.b32.xlu0 %v719_v20, %s1440_s19 }
 0xc8f   :  { %738 = vrot.lane.b32.xlu1 %v736_v22, %s1440_s19 }
 0xcff   :  { %v722_v25 = vpop.permute.xlu0 %721 }
 0xd00   :  { %v1750_v26 = vadd.f32 %v722_v25, %v714_v23 }
 0xd01   :  { %v739_v30 = vpop.permute.xlu1 %738 }
 0xd02   :  { %1378 = vtanh.f32 %v1750_v26  ;;  %v741_v31 = vadd.f32 %v739_v30, %v731_v28 }
 0xd04   :  { %1380 = vtanh.f32 %v741_v31 }
 0xd0f   :  { %v1379_v34 = vpop.eup %1378 }
 0xd10   :  { %727 = vrot.lane.b32.xlu0 %v1379_v34, %s1440_s19 }
 0xd11   :  { %v1381_v35 = vpop.eup %1380 }
 0xd12   :  { %744 = vrot.lane.b32.xlu1 %v1381_v35, %s1440_s19 }
 0xd82   :  { %v728_v38 = vpop.permute.xlu0 %727 }
 0xd83   :  { %v730_v39 = vmul.f32 %v728_v38, %v712_v17 }
 0xd84   :  { %v745_v24 = vpop.permute.xlu1 %744 }
 0xd85   :  { %v747_v32 = vmul.f32 %v745_v24, %v713_v18  ;;  %749 = vrot.lane.b32.xlu0 %v730_v39, %s1441_s20  ;;  %v154_v24 = vadd.f32 %v1661_v52, %v1566_v19 }
 0xd87   :  { %753 = vrot.lane.b32.xlu1 %v747_v32, %s1442_s27 }
 0xdf7   :  { %v750_v37 = vpop.permute.xlu0 %749 }
 0xdf9   :  { %v754_v33 = vpop.permute.xlu1 %753 }
 0xdfa   :  { %v756_v40 = vsel %vm331_vm2, %v750_v37, %v754_v33 }
 0xdfb   :  { %v757_v41 = vpack.c.bf16 %v756_v40, %v756_v40 }
 0xdfd   :  { %1256 = vmatmul.mubr.msk.bf16.vlgmr.msra.gmra.mxu1 %vm258_vm3, %v757_v41 }
 0xdfe   :  { %984 = vmatpush1.bf16.msra.mxu1 %v1490_v2  ;;  %1007 = vmatprep.mubr.bf16.mxu1 %v1438_v1 }
 0xdff   :  { %985 = vmatprep.subr.bf16.mxu1 %v1500_v4 }
 0xe02   :  { %986 = vmatpush1.bf16.msra.mxu1 %v1508_v6 }
 0xe03   :  { %987 = vmatprep.subr.bf16.mxu1 %v1517_v8 }
 0xe06   :  { %988 = vmatpush1.bf16.msra.mxu1 %v1524_v9 }
 0xe07   :  { %989 = vmatprep.subr.bf16.mxu1 %v1529_v10 }
 0xe0a   :  { %990 = vmatpush1.bf16.msra.mxu1 %v1540_v11 }
 0xebd   :  { %v797_v27 = vpop.f32.mrf.mxu1 }
 0xebe   :  { %v798_v43 = vadd.f32 %v797_v27, %v148_v36 }
 0xebf   :  { %v799_v56 = vpop.f32.mrf.mxu1 }
 0xec0   :  { %v1257_v57 = vmul.f32 -1.442695, %v798_v43  ;;  %v800_v58 = vadd.f32 %v799_v56, %v150_v42 }
 0xec1   :  { %v801_v59 = vpop.f32.mrf.mxu1 }
 0xec2   :  { %1382 = vpow2.f32 %v1257_v57  ;;  %v1258_v60 = vmul.f32 -1.442695, %v800_v58 }
 0xec3   :  { %v802_v61 = vpop.f32.mrf.mxu1 }
 0xec4   :  { %1384 = vpow2.f32 %v1258_v60 }
 0xec5   :  { %1386 = vtanh.f32 %v798_v43 }
 0xecf   :  { %v1383_v62 = vpop.eup %1382 }
 0xed0   :  { %v812_v63 = vadd.f32 1.0, %v1383_v62 }
 0xed1   :  { %v1385_v3 = vpop.eup %1384 }
 0xed2   :  { %1388 = vrcp.f32 %v812_v63  ;;  %v813_v5 = vadd.f32 1.0, %v1385_v3  ;;  %v1387_v50 = vpop.eup %1386 }
 0xed3   :  { %1390 = vtanh.f32 %v800_v58 }
 0xed4   :  { %1392 = vrcp.f32 %v813_v5 }
 0xedf   :  { %v1389_v12 = vpop.eup %1388 }
 0xee0   :  { %v1391_v51 = vpop.eup %1390  ;;  %v818_v13 = vsel %vm214_vm1, %v1387_v50, %v1389_v12 }
 0xee1   :  { %v1393_v15 = vpop.eup %1392  ;;  %822 = vrot.lane.b32.xlu0 %v818_v13, %s1440_s19  ;;  %v820_v45 = vmul.f32 %v818_v13, %v1750_v26 }
 0xee2   :  { %v819_v0 = vsel %vm1600_vm4, %v1391_v51, %v1393_v15 }
 0xee3   :  { %839 = vrot.lane.b32.xlu1 %v819_v0, %s1440_s19  ;;  %v837_v20 = vmul.f32 %v819_v0, %v741_v31 }
 0xf53   :  { %v823_v48 = vpop.permute.xlu0 %822 }
 0xf54   :  { %v825_v16 = vmul.f32 %v823_v48, %v818_v13 }
 0xf55   :  { %v840_v49 = vpop.permute.xlu1 %839 }
 0xf56   :  { %v842_v17 = vmul.f32 %v840_v49, %v819_v0  ;;  %827 = vrot.lane.b32.xlu0 %v825_v16, %s1440_s19 }
 0xf58   :  { %844 = vrot.lane.b32.xlu1 %v842_v17, %s1440_s19 }
 0xfc8   :  { %v828_v18 = vpop.permute.xlu0 %827 }
 0xfc9   :  { %v1781_v47 = vadd.f32 %v828_v18, %v820_v45  ;;  %v158_v45 = vadd.f32 %v1665_v54, %v1566_v19 }
 0xfca   :  { %v845_v21 = vpop.permute.xlu1 %844 }
 0xfcb   :  { %1394 = vtanh.f32 %v1781_v47  ;;  %v847_v22 = vadd.f32 %v845_v21, %v837_v20 }
 0xfcd   :  { %1396 = vtanh.f32 %v847_v22 }
 0xfd8   :  { %v1395_v23 = vpop.eup %1394 }
 0xfd9   :  { %833 = vrot.lane.b32.xlu0 %v1395_v23, %s1440_s19 }
 0xfda   :  { %v1397_v25 = vpop.eup %1396 }
 0xfdb   :  { %850 = vrot.lane.b32.xlu1 %v1397_v25, %s1440_s19 }
0x104b   :  { %v834_v28 = vpop.permute.xlu0 %833 }
0x104c   :  { %v836_v30 = vmul.f32 %v834_v28, %v818_v13 }
0x104d   :  { %v851_v34 = vpop.permute.xlu1 %850 }
0x104e   :  { %v853_v35 = vmul.f32 %v851_v34, %v819_v0  ;;  %855 = vrot.lane.b32.xlu0 %v836_v30, %s1441_s20 }
0x1050   :  { %859 = vrot.lane.b32.xlu1 %v853_v35, %s1442_s27 }
0x10c0   :  { %v856_v26 = vpop.permute.xlu0 %855 }
0x10c2   :  { %v860_v31 = vpop.permute.xlu1 %859 }
0x10c3   :  { %v862_v38 = vsel %vm331_vm2, %v856_v26, %v860_v31 }
0x10c4   :  { %v863_v39 = vpack.c.bf16 %v862_v38, %v862_v38 }
0x10c6   :  { %1259 = vmatmul.mubr.msk.bf16.vlgmr.msra.gmra.mxu0 %vm258_vm3, %v863_v39 }
0x10c7   :  { %1094 = vmatpush1.bf16.msra.mxu0 %v1490_v2  ;;  %1117 = vmatprep.mubr.bf16.mxu0 %v1438_v1  ;;  %v156_v2 = vadd.f32 %v1663_v53, %v1595_v46 }
0x10c8   :  { %1095 = vmatprep.subr.bf16.mxu0 %v1500_v4 }
0x10cb   :  { %1096 = vmatpush1.bf16.msra.mxu0 %v1508_v6 }
0x10cc   :  { %1097 = vmatprep.subr.bf16.mxu0 %v1517_v8 }
0x10cf   :  { %1098 = vmatpush1.bf16.msra.mxu0 %v1524_v9 }
0x10d0   :  { %1099 = vmatprep.subr.bf16.mxu0 %v1529_v10 }
0x10d3   :  { %1100 = vmatpush1.bf16.msra.mxu0 %v1540_v11 }
0x1186   :  { %v903_v32 = vpop.f32.mrf.mxu0 }
0x1187   :  { %v904_v1 = vadd.f32 %v903_v32, %v154_v24 }
0x1188   :  { %v905_v37 = vpop.f32.mrf.mxu0 }
0x1189   :  { %v1260_v4 = vmul.f32 -1.442695, %v904_v1  ;;  %v906_v33 = vadd.f32 %v905_v37, %v156_v2 }
0x118a   :  { %v907_v6 = vpop.f32.mrf.mxu0 }
0x118b   :  { %1398 = vpow2.f32 %v1260_v4  ;;  %v1261_v8 = vmul.f32 -1.442695, %v906_v33 }
0x118c   :  { %v908_v40 = vpop.f32.mrf.mxu0 }
0x118d   :  { %1400 = vpow2.f32 %v1261_v8 }
0x118e   :  { %1402 = vtanh.f32 %v904_v1 }
0x1198   :  { %v1399_v9 = vpop.eup %1398 }
0x1199   :  { %v918_v10 = vadd.f32 1.0, %v1399_v9 }
0x119a   :  { %v1401_v41 = vpop.eup %1400 }
0x119b   :  { %1404 = vrcp.f32 %v918_v10  ;;  %v919_v11 = vadd.f32 1.0, %v1401_v41  ;;  %v1403_v52 = vpop.eup %1402 }
0x119c   :  { %1406 = vtanh.f32 %v906_v33 }
0x119d   :  { %1408 = vrcp.f32 %v919_v11 }
0x11a8   :  { %v1405_v36 = vpop.eup %1404 }
0x11a9   :  { %v1407_v53 = vpop.eup %1406  ;;  %v924_v27 = vsel %vm214_vm1, %v1403_v52, %v1405_v36 }
0x11aa   :  { %v1409_v42 = vpop.eup %1408  ;;  %928 = vrot.lane.b32.xlu0 %v924_v27, %s1440_s19  ;;  %v926_v60 = vmul.f32 %v924_v27, %v1781_v47  ;;  %v160_v47 = vadd.f32 %v1667_v55, %v1595_v46 }
0x11ab   :  { %v925_v43 = vsel %vm1600_vm4, %v1407_v53, %v1409_v42 }
0x11ac   :  { %945 = vrot.lane.b32.xlu1 %v925_v43, %s1440_s19  ;;  %v943_v63 = vmul.f32 %v925_v43, %v847_v22 }
0x121c   :  { %v929_v56 = vpop.permute.xlu0 %928 }
0x121d   :  { %v931_v57 = vmul.f32 %v929_v56, %v924_v27 }
0x121e   :  { %v946_v58 = vpop.permute.xlu1 %945 }
0x121f   :  { %v948_v59 = vmul.f32 %v946_v58, %v925_v43  ;;  %933 = vrot.lane.b32.xlu0 %v931_v57, %s1440_s19 }
0x1221   :  { %950 = vrot.lane.b32.xlu1 %v948_v59, %s1440_s19 }
0x1291   :  { %v934_v61 = vpop.permute.xlu0 %933 }
0x1292   :  { %v936_v62 = vadd.f32 %v934_v61, %v926_v60 }
0x1293   :  { %v951_v3 = vpop.permute.xlu1 %950 }
0x1294   :  { %1410 = vtanh.f32 %v936_v62  ;;  %v953_v5 = vadd.f32 %v951_v3, %v943_v63 }
0x1296   :  { %1412 = vtanh.f32 %v953_v5 }
0x12a1   :  { %v1411_v50 = vpop.eup %1410 }
0x12a2   :  { %939 = vrot.lane.b32.xlu0 %v1411_v50, %s1440_s19 }
0x12a3   :  { %v1413_v12 = vpop.eup %1412 }
0x12a4   :  { %956 = vrot.lane.b32.xlu1 %v1413_v12, %s1440_s19 }
0x1314   :  { %v940_v51 = vpop.permute.xlu0 %939 }
0x1315   :  { %v942_v13 = vmul.f32 %v940_v51, %v924_v27 }
0x1316   :  { %v957_v15 = vpop.permute.xlu1 %956 }
0x1317   :  { %v959_v0 = vmul.f32 %v957_v15, %v925_v43  ;;  %961 = vrot.lane.b32.xlu0 %v942_v13, %s1441_s20  ;;  %v186_v43 = vld [vmem:[%s1862_s2] sm:$0x3] }
0x1318   :  { %v1080_v56 = vrot.slane %v186_v43, %v42_v44 }
0x1319   :  { %965 = vrot.lane.b32.xlu1 %v959_v0, %s1442_s27  ;;  %v1443_v0 = vmov 0.0  }
0x131a   :  { %1274 = vmatprep.subr.bf16.mxu1 %v1443_v0 }
0x1389   :  { %v962_v48 = vpop.permute.xlu0 %961 }
0x138b   :  { %v966_v16 = vpop.permute.xlu1 %965 }
0x138c   :  { %v968_v49 = vsel %vm331_vm2, %v962_v48, %v966_v16  ;;  %v1308_v48 = vld [vmem:[%s1863_s4 + $0x8] sm:$0xff]  }
0x138d   :  { %v969_v17 = vpack.c.bf16 %v968_v49, %v968_v49 }
0x138f   :  { %1262 = vmatmul.mubr.msk.bf16.vlgmr.msra.gmra.mxu1 %vm258_vm3, %v969_v17 }
0x1390   :  { %1278 = vmatprep.mubr.msk.bf16.mxu1 %vm1444_vm5, %v1443_v0  ;;  %1275 = vmatpush3.bf16.msra.mxu1 %v1308_v48 }
0x1391   :  { %1276 = vmatprep.subr.bf16.mxu1 %v1443_v0 }
0x1394   :  { %1277 = vmatpush3.bf16.msra.mxu1 %v1309_v7 }
0x144f   :  { %v1009_v18 = vpop.f32.mrf.mxu1 }
0x1450   :  { %v1010_v20 = vadd.f32 %v1009_v18, %v158_v45 }
0x1451   :  { %v1011_v21 = vpop.f32.mrf.mxu1 }
0x1452   :  { %v1263_v22 = vmul.f32 -1.442695, %v1010_v20  ;;  %v1012_v23 = vadd.f32 %v1011_v21, %v160_v47  ;;  %v1267_v47 = vld [vmem:[%s1864_s5] ss:$0 sm:$0xff] }
0x1453   :  { %v1013_v25 = vpop.f32.mrf.mxu1 }
0x1454   :  { %1414 = vpow2.f32 %v1263_v22  ;;  %v1264_v28 = vmul.f32 -1.442695, %v1012_v23 }
0x1455   :  { %v1014_v30 = vpop.f32.mrf.mxu1 }
0x1456   :  { %1416 = vpow2.f32 %v1264_v28 }
0x1457   :  { %1418 = vtanh.f32 %v1010_v20 }
0x1461   :  { %v1415_v34 = vpop.eup %1414 }
0x1462   :  { %v1024_v35 = vadd.f32 1.0, %v1415_v34 }
0x1463   :  { %v1417_v26 = vpop.eup %1416 }
0x1464   :  { %1420 = vrcp.f32 %v1024_v35  ;;  %v1025_v31 = vadd.f32 1.0, %v1417_v26  ;;  %v1419_v19 = vpop.eup %1418 }
0x1465   :  { %1422 = vtanh.f32 %v1012_v23 }
0x1466   :  { %1424 = vrcp.f32 %v1025_v31 }
0x1471   :  { %v1421_v54 = vpop.eup %1420 }
0x1472   :  { %v1423_v46 = vpop.eup %1422  ;;  %v1030_v55 = vsel %vm214_vm1, %v1419_v19, %v1421_v54 }
0x1473   :  { %v1425_v38 = vpop.eup %1424  ;;  %1034 = vrot.lane.b32.xlu0 %v1030_v55, %s1440_s19  ;;  %v1032_v37 = vmul.f32 %v1030_v55, %v936_v62 }
0x1474   :  { %v1031_v39 = vsel %vm1600_vm4, %v1423_v46, %v1425_v38 }
0x1475   :  { %1051 = vrot.lane.b32.xlu1 %v1031_v39, %s1440_s19  ;;  %v1049_v33 = vmul.f32 %v1031_v39, %v953_v5 }
0x14e5   :  { %v1035_v24 = vpop.permute.xlu0 %1034 }
0x14e6   :  { %v1037_v32 = vmul.f32 %v1035_v24, %v1030_v55 }
0x14e7   :  { %v1052_v2 = vpop.permute.xlu1 %1051 }
0x14e8   :  { %v1054_v1 = vmul.f32 %v1052_v2, %v1031_v39  ;;  %1039 = vrot.lane.b32.xlu0 %v1037_v32, %s1440_s19 }
0x14ea   :  { %1056 = vrot.lane.b32.xlu1 %v1054_v1, %s1440_s19 }
0x155a   :  { %v1040_v4 = vpop.permute.xlu0 %1039 }
0x155b   :  { %v1042_v29 = vadd.f32 %v1040_v4, %v1032_v37 }
0x155c   :  { %v1057_v6 = vpop.permute.xlu1 %1056 }
0x155d   :  { %1426 = vtanh.f32 %v1042_v29  ;;  %v1059_v8 = vadd.f32 %v1057_v6, %v1049_v33 }
0x155f   :  { %1428 = vtanh.f32 %v1059_v8 }
0x156a   :  { %v1427_v40 = vpop.eup %1426 }
0x156b   :  { %1045 = vrot.lane.b32.xlu0 %v1427_v40, %s1440_s19 }
0x156c   :  { %v1429_v9 = vpop.eup %1428 }
0x156d   :  { %1062 = vrot.lane.b32.xlu1 %v1429_v9, %s1440_s19 }
0x15dd   :  { %v1046_v10 = vpop.permute.xlu0 %1045 }
0x15de   :  { %v1048_v41 = vmul.f32 %v1046_v10, %v1030_v55 }
0x15df   :  { %v1063_v11 = vpop.permute.xlu1 %1062 }
0x15e0   :  { %v1065_v52 = vmul.f32 %v1063_v11, %v1031_v39  ;;  %1067 = vrot.lane.b32.xlu0 %v1048_v41, %s1441_s20 }
0x15e2   :  { %1071 = vrot.lane.b32.xlu1 %v1065_v52, %s1442_s27 }
0x1652   :  { %v1068_v36 = vpop.permute.xlu0 %1067 }
0x1654   :  { %v1072_v53 = vpop.permute.xlu1 %1071 }
0x1655   :  { %v1074_v27 = vsel %vm331_vm2, %v1068_v36, %v1072_v53 }
0x1656   :  { %v1075_v42 = vpack.c.bf16 %v1074_v27, %v1074_v27 }
0x1658   :  { %1265 = vmatmul.mubr.msk.bf16.vlgmr.msra.gmra.mxu0 %vm258_vm3, %v1075_v42 }
0x1718   :  { %v1119_v57 = vpop.f32.mrf.mxu0 }
0x171a   :  { %v1120_v58 = vpop.f32.mrf.mxu0 }
0x171b   :  { %v1121_v59 = vadd.f32 %v1120_v58, %v1080_v56 }
0x171c   :  { %v1122_v60 = vpop.f32.mrf.mxu0 }
0x171d   :  { %v1266_v61 = vmul.f32 -1.442695, %v1121_v59 }
0x171e   :  { %v1123_v62 = vpop.f32.mrf.mxu0 }
0x171f   :  { %1430 = vpow2.f32 %v1266_v61 }
0x1720   :  { %1432 = vtanh.f32 %v1121_v59 }
0x172c   :  { %v1431_v63 = vpop.eup %1430 }
0x172d   :  { %v1129_v3 = vadd.f32 1.0, %v1431_v63  ;;  %v1433_v5 = vpop.eup %1432 }
0x172f   :  { %1434 = vrcp.f32 %v1129_v3 }
0x173c   :  { %v1435_v50 = vpop.eup %1434 }
0x173d   :  { %v1132_v12 = vsel %vm1600_vm4, %v1433_v5, %v1435_v50 }
0x173e   :  { %1135 = vrot.lane.b32.xlu0 %v1132_v12, %s1440_s19  ;;  %v1133_v51 = vmul.f32 %v1132_v12, %v1059_v8 }
0x17b0   :  { %v1136_v14 = vpop.permute.xlu0 %1135 }
0x17b1   :  { %v1138_v44 = vmul.f32 %v1136_v14, %v1132_v12 }
0x17b3   :  { %1140 = vrot.lane.b32.xlu1 %v1138_v44, %s1440_s19 }
0x1825   :  { %v1141_v13 = vpop.permute.xlu1 %1140 }
0x1826   :  { %v1143_v15 = vadd.f32 %v1141_v13, %v1133_v51 }
0x1828   :  { %1436 = vtanh.f32 %v1143_v15 }
0x1835   :  { %v1437_v16 = vpop.eup %1436 }
0x1836   :  { %1146 = vrot.lane.b32.xlu0 %v1437_v16, %s1440_s19 }
0x18a8   :  { %v1147_v49 = vpop.permute.xlu0 %1146 }
0x18a9   :  { %v1149_v17 = vmul.f32 %v1147_v49, %v1132_v12 }
0x18ab   :  { %v1150_v45 = vpack.c.bf16 %v1149_v17, %v1149_v17 }
0x18ad   :  { %1163 = vrot.lane.b32.xlu1 %v1150_v45, %s1441_s20 }
0x191f   :  { %v1164_v18 = vpop.permute.xlu1 %1163 }
0x1920   :  { %1279 = vmatmul.mubr.msk.bf16.vlgmr.msra.gmra.mxu1 %vm331_vm2, %v1164_v18 }
0x19e0   :  { %v1214_v20 = vpop.f32.mrf.mxu1 }
0x19e1   :  { %v1215_v21 = vadd.f32 %v1267_v47, %v1214_v20 }
0x19e2   :  { %v1280_v22 = vpop.f32.mrf.mxu1 }
0x19e3   :  { %1220 = vst [vmem:[%s1865_s6] sm:$0xff] %v1215_v21 }
0x19e4   :  { %v1217_v23 = vpop.f32.mrf.mxu1 }
0x19e6   :  { %v1281_v25 = vpop.f32.mrf.mxu1 }

</bundles_post_ra>
